<compile_context>
chip_gen: v6e
topology: v6e:2x2x1
jax: 0.10.0
libtpu: 0.0.40
codegen_flags: <defaults>
</compile_context>

<pallas_src>
import numpy as np
import jax
import jax.numpy as jnp
from jax.experimental import pallas as pl
from jax.experimental.pallas import tpu as pltpu

EPS = 1e-5                           # torch BatchNorm2d default eps
LANE = 128                           # TPU lane width: keep channel dims lane-dense
MXU_DTYPE = jnp.bfloat16             # MXU-native operand dtype (f32 accumulation)
W_RESIDENT_BYTES = 8 * 1024 * 1024   # keep weights resident in VMEM below this


# ----------------------------------------------------------------------------
# small helpers
# ----------------------------------------------------------------------------
def _round_up(x, m):
    return ((x + m - 1) // m) * m


def _largest_tile(dim, unit, cap):
    """Largest multiple of `unit` that divides `dim` (dim % unit == 0), <= cap."""
    n = dim // unit
    best = 1
    for d in range(1, n + 1):
        if unit * d > cap:
            break
        if n % d == 0:
            best = d
    return unit * best


def _pad_last(a, target):
    pad = target - a.shape[-1]
    if pad == 0:
        return a
    return jnp.pad(a, [(0, 0)] * (a.ndim - 1) + [(0, pad)])


def _pad_rows(a, target):
    pad = target - a.shape[0]
    if pad == 0:
        return a
    return jnp.pad(a, [(0, pad)] + [(0, 0)] * (a.ndim - 1))


_VMEM_LIMIT_CACHE = None


def _vmem_limit():
    """~75% of physical VMEM (v5e/v6e: 128 MiB, v7x: 64 MiB), with a safe fallback."""
    global _VMEM_LIMIT_CACHE
    if _VMEM_LIMIT_CACHE is None:
        limit = 48 * 1024 * 1024
        try:
            info = pltpu.get_tpu_info()
            cap = (getattr(info, "vmem_capacity_bytes", None)
                   or getattr(info, "vmem_size_bytes", None))
            if cap:
                limit = int(max(32 << 20, min(int(cap * 0.75), 96 << 20)))
        except Exception:
            pass
        _VMEM_LIMIT_CACHE = limit
    return _VMEM_LIMIT_CACHE


# ----------------------------------------------------------------------------
# Pallas kernels
# ----------------------------------------------------------------------------
def _make_matmul_kernel(*, tm, tk, fuse_prologue, w_resident, single_k,
                        m_real, mask_rows):
    """K-tiled matmul with fused BN batch-stats epilogue.

    Optional prologue (fuse_prologue): a = relu(a * scale + shift) applied to
    the loaded A tile (per-K-column scale/shift) -- used to fuse BN1+ReLU into
    conv2 so the activation intermediate never touches HBM.
    """
    def compute(x_ref, w_ref, s_ref, t_ref, y_ref, st_ref, acc_ref):
        k = pl.program_id(2)

        a = x_ref[...]
        if fuse_prologue:
            a = jnp.maximum(a.astype(jnp.float32) * s_ref[...] + t_ref[...], 0.0)
            if mask_rows:
                # zero rows past the real M so the fused stats stay exact
                rows = (pl.program_id(0) * tm
                        + jax.lax.broadcasted_iota(jnp.int32, (tm, 1), 0))
                a = jnp.where(rows < m_real, a, 0.0)
            a = a.astype(MXU_DTYPE)

        if w_resident and not single_k:
            kk = pl.multiple_of(k * tk, tk)
            w = w_ref[pl.ds(kk, tk), :]          # slice resident weight in VMEM
        else:
            w = w_ref[...]

        prod = jnp.dot(a, w, preferred_element_type=jnp.float32)

        def finalize(y):
            y_ref[...] = y.astype(y_ref.dtype)
            st_ref[0:1, :] = jnp.sum(y, axis=0, keepdims=True)
            st_ref[1:2, :] = jnp.sum(y * y, axis=0, keepdims=True)

        if single_k:
            finalize(prod)
        else:
            @pl.when(k == 0)
            def _init():
                acc_ref[...] = prod              # init with first dot, no zero-fill

            @pl.when(k > 0)
            def _acc():
                acc_ref[...] += prod

            @pl.when(k == pl.num_programs(2) - 1)
            def _fin():
                finalize(acc_ref[...])

    if fuse_prologue and single_k:
        def kernel(x, w, s, t, y, st):
            compute(x, w, s, t, y, st, None)
    elif fuse_prologue:
        def kernel(x, w, s, t, y, st, acc):
            compute(x, w, s, t, y, st, acc)
    elif single_k:
        def kernel(x, w, y, st):
            compute(x, w, None, None, y, st, None)
    else:
        def kernel(x, w, y, st, acc):
            compute(x, w, None, None, y, st, acc)
    return kernel


def _bn_add_bn_relu_kernel(y_ref, r_ref, s_ref, t_ref, si_ref, ti_ref, o_ref):
    """relu( (y*s + t) + (residual*si + ti) ) -- fuses bn2 affine, the shortcut
    BN affine (or identity via si=1, ti=0), the residual add and the ReLU."""
    main = y_ref[...].astype(jnp.float32) * s_ref[...] + t_ref[...]
    res = r_ref[...].astype(jnp.float32) * si_ref[...] + ti_ref[...]
    o_ref[...] = jnp.maximum(main + res, 0.0)


# ----------------------------------------------------------------------------
# Pallas wrappers
# ----------------------------------------------------------------------------
def pallas_matmul_stats(x, w, scale=None, shift=None):
    """y = A @ w with A = relu(x*scale + shift) if scale is given else x.
    Operands bf16, f32 accumulation.  Also returns per-column [sum; sum_sq] of
    y taken from the f32 accumulator (fused BN batch statistics).  Returns y
    with lane-padded columns (zero in the pad) and stats of the same width."""
    M, K = x.shape
    K2, Nc = w.shape
    assert K == K2
    fuse = scale is not None

    Kp = _round_up(K, LANE)
    Npad = _round_up(Nc, LANE)
    x = _pad_last(x.astype(MXU_DTYPE), Kp)
    w = jnp.pad(w.astype(MXU_DTYPE), ((0, Kp - K), (0, Npad - Nc)))

    # row tile: big, but keep >= 2 row blocks so both v7x cores get work
    TM = min(512, max(8, _round_up((M + 1) // 2, 8)))
    Mp = _round_up(M, TM)
    x = _pad_rows(x, Mp)

    # weight residency / N tiling
    w_resident = (Kp * Npad * 2) <= W_RESIDENT_BYTES
    if w_resident:
        TN = Npad
    else:
        TN = min(256, Npad)
        Npad2 = _round_up(Npad, TN)
        if Npad2 != Npad:
            w = jnp.pad(w, ((0, 0), (0, Npad2 - Npad)))
            Npad = Npad2

    TK = _largest_tile(Kp, LANE, 1024)            # deep K tiles, no extra zero-pad
    num_i, num_j, num_k = Mp // TM, Npad // TN, Kp // TK
    single_k = num_k == 1
    mask_rows = fuse and (Mp != M)

    kernel = _make_matmul_kernel(tm=TM, tk=TK, fuse_prologue=fuse,
                                 w_resident=w_resident, single_k=single_k,
                                 m_real=M, mask_rows=mask_rows)

    in_specs = [pl.BlockSpec((TM, TK), lambda i, j, k: (i, k))]
    if w_resident:
        # constant block index -> the weight is DMAed into VMEM exactly once
        in_specs.append(pl.BlockSpec((Kp, Npad), lambda i, j, k: (0, 0)))
    else:
        in_specs.append(pl.BlockSpec((TK, TN), lambda i, j, k: (k, j)))
    operands = [x, w]
    if fuse:
        s_row = _pad_last(jnp.asarray(scale, jnp.float32).reshape(1, K), Kp)
        t_row = _pad_last(jnp.asarray(shift, jnp.float32).reshape(1, K), Kp)
        in_specs += [pl.BlockSpec((1, TK), lambda i, j, k: (0, k)),
                     pl.BlockSpec((1, TK), lambda i, j, k: (0, k))]
        operands += [s_row, t_row]

    scratch = [] if single_k else [pltpu.VMEM((TM, TN), jnp.float32)]

    y, st = pl.pallas_call(
        kernel,
        out_shape=(jax.ShapeDtypeStruct((Mp, Npad), MXU_DTYPE),
                   jax.ShapeDtypeStruct((num_i, num_j, 2, TN), jnp.float32)),
        grid=(num_i, num_j, num_k),
        in_specs=in_specs,
        out_specs=(pl.BlockSpec((TM, TN), lambda i, j, k: (i, j)),
                   pl.BlockSpec((None, None, 2, TN),
                                lambda i, j, k: (i, j, 0, 0))),
        scratch_shapes=scratch,
        compiler_params=pltpu.CompilerParams(
            dimension_semantics=("parallel", "parallel", "arbitrary"),
            vmem_limit_bytes=_vmem_limit()),
    )(*operands)

    # tiny cross-tile reduction of the per-(i, j) partial stats (zero-padded
    # rows / columns contribute nothing).
    stats = jnp.transpose(st.sum(axis=0), (1, 0, 2)).reshape(2, Npad)
    return y[:M], stats


def _ew_tile(M):
    # up to 1024 rows, but keep >= 2 blocks so both v7x cores get work
    TM = min(1024, max(8, _round_up((M + 1) // 2, 8)))
    return TM, _round_up(M, TM)


def pallas_bn_add_bn_relu(y, res, scale, shift, rscale, rshift):
    M, C = y.shape
    TM, Mp = _ew_tile(M)
    y = _pad_rows(y, Mp)
    res = _pad_rows(res, Mp)
    out = pl.pallas_call(
        _bn_add_bn_relu_kernel,
        out_shape=jax.ShapeDtypeStruct((Mp, C), jnp.float32),
        grid=(Mp // TM,),
        in_specs=[pl.BlockSpec((TM, C), lambda i: (i, 0)),
                  pl.BlockSpec((TM, C), lambda i: (i, 0)),
                  pl.BlockSpec((1, C), lambda i: (0, 0)),
                  pl.BlockSpec((1, C), lambda i: (0, 0)),
                  pl.BlockSpec((1, C), lambda i: (0, 0)),
                  pl.BlockSpec((1, C), lambda i: (0, 0))],
        out_specs=pl.BlockSpec((TM, C), lambda i: (i, 0)),
        compiler_params=pltpu.CompilerParams(
            dimension_semantics=("parallel",),
            vmem_limit_bytes=_vmem_limit()),
    )(y, res, scale.reshape(1, C), shift.reshape(1, C),
      rscale.reshape(1, C), rshift.reshape(1, C))
    return out[:M]


# ----------------------------------------------------------------------------
# conv / BN building blocks (NHWC, unpadded channels in, lane-padded out)
# ----------------------------------------------------------------------------
def conv3x3_stats(x_nhwc, w, scale=None, shift=None):
    """Conv2d(k=3, pad=1, no bias) + fused per-channel sum / sum-of-squares.
    If scale/shift are given, relu(x*scale + shift) is applied per input
    channel inside the matmul kernel (fused BN+ReLU prologue).  K is padded
    only after flattening to 9*Cin (no per-tap channel padding)."""
    N, H, W_, C = x_nhwc.shape
    cout = w.shape[0]

    xp = jnp.pad(x_nhwc.astype(MXU_DTYPE), ((0, 0), (1, 1), (1, 1), (0, 0)))
    # TODO(synk): stream the 9 taps straight from the padded activation
    # (element-offset row slabs + in-VMEM W shifts) instead of materializing
    # this bf16 im2col buffer in HBM; it is the remaining dominant HBM traffic
    # for large feature maps.
    patches = jnp.concatenate(
        [xp[:, dh:dh + H, dw:dw + W_, :] for dh in range(3) for dw in range(3)],
        axis=-1).reshape(N * H * W_, 9 * C)

    wm = jnp.transpose(w, (2, 3, 1, 0)).reshape(9 * C, cout)     # (9*cin, cout)

    if scale is not None:
        scale = jnp.tile(jnp.asarray(scale, jnp.float32).reshape(C), 9)
        shift = jnp.tile(jnp.asarray(shift, jnp.float32).reshape(C), 9)
    return pallas_matmul_stats(patches, wm, scale, shift)


def conv1x1_stats(x_nhwc, w):
    """Conv2d(k=1, no bias) + fused per-channel sum / sum-of-squares."""
    N, H, W_, C = x_nhwc.shape
    cout = w.shape[0]
    wm = w.reshape(cout, C).T                                    # (cin, cout)
    xm = x_nhwc.reshape(N * H * W_, C).astype(MXU_DTYPE)
    return pallas_matmul_stats(xm, wm)


def bn_scale_shift(stats, m_real, gamma, beta):
    """Training-mode BatchNorm: fold batch stats + gamma/beta into a per-channel
    affine (scale, shift).  Biased variance like torch BN in train mode.
    (E[x^2]-E[x]^2 in f32 is fine for conv outputs of normalized activations.)"""
    cpad = stats.shape[-1]
    g = _pad_last(gamma, cpad)
    b = _pad_last(beta, cpad)
    mean = stats[0] / m_real
    var = jnp.maximum(stats[1] / m_real - mean * mean, 0.0)
    scale = g * jax.lax.rsqrt(var + EPS)
    shift = b - mean * scale
    return scale, shift


# ----------------------------------------------------------------------------
# ResidualBlock forward (matches the PyTorch module's forward, training-mode BN)
# ----------------------------------------------------------------------------
def residual_block_forward(x_nchw, params):
    N, Cin, H, W_ = x_nchw.shape
    Cout = params["w1"].shape[0]
    M = N * H * W_

    # TODO(synk): fuse the NCHW<->NHWC transposes into the boundary kernels if
    # the surrounding model cannot stay NHWC end-to-end.
    x = jnp.transpose(x_nchw, (0, 2, 3, 1))          # NCHW -> NHWC

    # main path: conv1 (+fused stats) -> [bn1+relu fused into conv2] -> conv2
    # (conv biases are omitted: they cancel exactly inside training-mode BN)
    y1, st1 = conv3x3_stats(x, params["w1"])                     # (M, Cp) bf16
    Cp = y1.shape[-1]                                            # lane-padded Cout
    s1, t1 = bn_scale_shift(st1, M, params["g1"], params["b1"])

    a1_img = y1[:, :Cout].reshape(N, H, W_, Cout)                # unpadded channels
    y2, st2 = conv3x3_stats(a1_img, params["w2"], s1[:Cout], t1[:Cout])
    s2, t2 = bn_scale_shift(st2, M, params["g2"], params["b2"])

    # shortcut path
    if "ws" in params:                                           # Conv1x1 -> BN
        res, stsc = conv1x1_stats(x, params["ws"])               # (M, Cp) bf16
        ssc, tsc = bn_scale_shift(stsc, M, params["gs"], params["bs"])
    else:                                                        # Identity
        assert Cin == Cout, "identity shortcut requires in_channels == out_channels"
        res = _pad_last(x.reshape(M, Cin), Cp)                   # f32, exact
        ssc = jnp.ones((Cp,), jnp.float32)
        tsc = jnp.zeros((Cp,), jnp.float32)

    out = pallas_bn_add_bn_relu(y2, res, s2, t2, ssc, tsc)       # (M, Cp) f32
    out = out.reshape(N, H, W_, Cp)[..., :Cout]                  # drop lane pad
    return jnp.transpose(out, (0, 3, 1, 2))                      # NHWC -> NCHW


# ----------------------------------------------------------------------------
# parameters + pure-JAX reference
# ----------------------------------------------------------------------------
def init_residual_block_params(key, in_channels, out_channels):
    k1, k2, k3 = jax.random.split(key, 3)

    def conv_w(k, co, ci, ksz):
        bound = 1.0 / np.sqrt(ci * ksz * ksz)
        return jax.random.uniform(k, (co, ci, ksz, ksz), jnp.float32, -bound, bound)

    p = {
        "w1": conv_w(k1, out_channels, in_channels, 3),
        "g1": jnp.ones((out_channels,), jnp.float32),
        "b1": jnp.zeros((out_channels,), jnp.float32),
        "w2": conv_w(k2, out_channels, out_channels, 3),
        "g2": jnp.ones((out_channels,), jnp.float32),
        "b2": jnp.zeros((out_channels,), jnp.float32),
    }
    if in_channels != out_channels:
        p["ws"] = conv_w(k3, out_channels, in_channels, 1)
        p["gs"] = jnp.ones((out_channels,), jnp.float32)
        p["bs"] = jnp.zeros((out_channels,), jnp.float32)
    return p


def reference_forward(x_nchw, params):
    """Pure-JAX f32 reference of the PyTorch ResidualBlock (training-mode BN)."""
    def conv(x, w, pad):
        return jax.lax.conv_general_dilated(
            x, w, window_strides=(1, 1), padding=[(pad, pad), (pad, pad)],
            dimension_numbers=("NCHW", "OIHW", "NCHW"))

    def bn(y, g, b):
        mean = jnp.mean(y, axis=(0, 2, 3), keepdims=True)
        var = jnp.mean(jnp.square(y - mean), axis=(0, 2, 3), keepdims=True)
        return ((y - mean) * jax.lax.rsqrt(var + EPS) * g.reshape(1, -1, 1, 1)
                + b.reshape(1, -1, 1, 1))

    out = jax.nn.relu(bn(conv(x_nchw, params["w1"], 1), params["g1"], params["b1"]))
    out = bn(conv(out, params["w2"], 1), params["g2"], params["b2"])
    if "ws" in params:
        identity = bn(conv(x_nchw, params["ws"], 0), params["gs"], params["bs"])
    else:
        identity = x_nchw
    return jax.nn.relu(out + identity)


# ----------------------------------------------------------------------------
if __name__ == "__main__":
    key = jax.random.PRNGKey(0)
    k_in, k_p1, k_p2, k_in2 = jax.random.split(key, 4)

    fwd = jax.jit(residual_block_forward)

    # config 1: in_channels != out_channels  ->  Conv1x1 + BN shortcut
    N, Cin, H, W, Cout = 2, 4, 16, 16, 8
    x = jax.random.normal(k_in, (N, Cin, H, W), jnp.float32)
    params = init_residual_block_params(k_p1, Cin, Cout)

    out = jax.block_until_ready(fwd(x, params))
    assert out.shape == (N, Cout, H, W), out.shape
    assert out.dtype == jnp.float32
    assert bool(jnp.all(jnp.isfinite(out)))
    assert bool(jnp.all(out >= 0.0))                 # ReLU output

    ref = reference_forward(x, params)
    max_err = float(jnp.max(jnp.abs(out - ref)))
    mean_err = float(jnp.mean(jnp.abs(out - ref)))
    assert max_err < 0.75 and mean_err < 0.05, (max_err, mean_err)  # bf16 MXU tol

    # config 2: in_channels == out_channels  ->  Identity shortcut
    x2 = jax.random.normal(k_in2, (N, Cout, H, W), jnp.float32)
    params2 = init_residual_block_params(k_p2, Cout, Cout)
    out2 = jax.block_until_ready(fwd(x2, params2))
    assert out2.shape == (N, Cout, H, W)
    assert bool(jnp.all(jnp.isfinite(out2)))
    ref2 = reference_forward(x2, params2)
    assert float(jnp.mean(jnp.abs(out2 - ref2))) < 0.05

    print("KERNEL_OK")
</pallas_src>

<mosaic_0001>
module attributes {stable_mosaic.version = 11 : i64} {
  func.func @kernel(%arg0: i32, %arg1: i32, %arg2: i32, %arg3: memref<256x128xbf16, #tpu.memory_space<vmem>>, %arg4: memref<128x128xbf16, #tpu.memory_space<vmem>>, %arg5: memref<256x128xbf16, #tpu.memory_space<vmem>>, %arg6: memref<1x1x2x128xf32, #tpu.memory_space<vmem>>) attributes {dimension_semantics = [#tpu.dimension_semantics<parallel>, #tpu.dimension_semantics<parallel>, #tpu.dimension_semantics<arbitrary>], iteration_bounds = array<i64: 2, 1, 1>, scalar_prefetch = 0 : i64, scratch_operands = 0 : i64, tpu.core_type = #tpu.core_type<tc>, window_params = [{transform_indices = @transform_0, window_bounds = array<i64: 256, 128>}, {pipeline_mode = #tpu.pipeline_mode<synchronous>, transform_indices = @transform_1, window_bounds = array<i64: 128, 128>}, {transform_indices = @transform_2, window_bounds = array<i64: 256, 128>}, {transform_indices = @transform_3, window_bounds = array<i64: 1, 1, 2, 128>}]} {
    %c0 = arith.constant 0 : index
    %c0_0 = arith.constant 0 : index
    %0 = vector.load %arg3[%c0, %c0_0] : memref<256x128xbf16, #tpu.memory_space<vmem>>, vector<256x128xbf16>
    %c0_1 = arith.constant 0 : index
    %c0_2 = arith.constant 0 : index
    %1 = vector.load %arg4[%c0_1, %c0_2] : memref<128x128xbf16, #tpu.memory_space<vmem>>, vector<128x128xbf16>
    %cst = arith.constant dense<0.000000e+00> : vector<256x128xf32>
    %2 = tpu.matmul %0, %1, %cst {dimension_numbers = #tpu.dot_dimension_numbers<[1], [0], [0], [1], [0, 0, 1, 1], [], []>} : vector<256x128xbf16>, vector<128x128xbf16>, vector<256x128xf32> -> vector<256x128xf32>
    %3 = arith.truncf %2 : vector<256x128xf32> to vector<256x128xbf16>
    %c0_3 = arith.constant 0 : index
    %c0_4 = arith.constant 0 : index
    %4 = vector.load %arg5[%c0_3, %c0_4] : memref<256x128xbf16, #tpu.memory_space<vmem>>, vector<256x128xbf16>
    tpu.vector_store %arg5[%c0_3, %c0_4], %3 {strides = array<i32>} : memref<256x128xbf16, #tpu.memory_space<vmem>>, vector<256x128xbf16>,
    %cst_5 = arith.constant dense<0.000000e+00> : vector<128xf32>
    %5 = vector.multi_reduction <add>, %2, %cst_5 [0] : vector<256x128xf32> to vector<128xf32>
    %6 = vector.shape_cast %5 : vector<128xf32> to vector<1x128xf32>
    %c0_6 = arith.constant 0 : index
    %c0_7 = arith.constant 0 : index
    %c0_8 = arith.constant 0 : index
    %c0_9 = arith.constant 0 : index
    %7 = vector.load %arg6[%c0_6, %c0_7, %c0_8, %c0_9] : memref<1x1x2x128xf32, #tpu.memory_space<vmem>>, vector<1x1x1x128xf32>
    %8 = vector.shape_cast %7 : vector<1x1x1x128xf32> to vector<1x128xf32>
    %9 = vector.shape_cast %6 : vector<1x128xf32> to vector<1x1x1x128xf32>
    tpu.vector_store %arg6[%c0_6, %c0_7, %c0_8, %c0_9], %9 {strides = array<i32>} : memref<1x1x2x128xf32, #tpu.memory_space<vmem>>, vector<1x1x1x128xf32>,
    %10 = arith.mulf %2, %2 : vector<256x128xf32>
    %cst_10 = arith.constant dense<0.000000e+00> : vector<128xf32>
    %11 = vector.multi_reduction <add>, %10, %cst_10 [0] : vector<256x128xf32> to vector<128xf32>
    %12 = vector.shape_cast %11 : vector<128xf32> to vector<1x128xf32>
    %c0_11 = arith.constant 0 : index
    %c0_12 = arith.constant 0 : index
    %c1 = arith.constant 1 : index
    %c0_13 = arith.constant 0 : index
    %13 = vector.load %arg6[%c0_11, %c0_12, %c1, %c0_13] : memref<1x1x2x128xf32, #tpu.memory_space<vmem>>, vector<1x1x1x128xf32>
    %14 = vector.shape_cast %13 : vector<1x1x1x128xf32> to vector<1x128xf32>
    %15 = vector.shape_cast %12 : vector<1x128xf32> to vector<1x1x1x128xf32>
    tpu.vector_store %arg6[%c0_11, %c0_12, %c1, %c0_13], %15 {strides = array<i32>} : memref<1x1x2x128xf32, #tpu.memory_space<vmem>>, vector<1x1x1x128xf32>,
    return
  }
  func.func @transform_0(%arg0: i32, %arg1: i32, %arg2: i32) -> (i32, i32) {
    %c0_i32 = arith.constant 0 : i32
    return %arg0, %arg2 : i32, i32
  }
  func.func @transform_1(%arg0: i32, %arg1: i32, %arg2: i32) -> (i32, i32) {
    %c0_i32 = arith.constant 0 : i32
    %c0_i32_0 = arith.constant 0 : i32
    %c0_i32_1 = arith.constant 0 : i32
    return %c0_i32, %c0_i32_0 : i32, i32
  }
  func.func @transform_2(%arg0: i32, %arg1: i32, %arg2: i32) -> (i32, i32) {
    %c0_i32 = arith.constant 0 : i32
    return %arg0, %arg1 : i32, i32
  }
  func.func @transform_3(%arg0: i32, %arg1: i32, %arg2: i32) -> (i32, i32, i32, i32) {
    %c0_i32 = arith.constant 0 : i32
    %c0_i32_0 = arith.constant 0 : i32
    %c0_i32_1 = arith.constant 0 : i32
    return %arg0, %arg1, %c0_i32, %c0_i32_0 : i32, i32, i32, i32
  }
}

module attributes {stable_mosaic.version = 11 : i64} {
  func.func @kernel(%arg0: i32, %arg1: i32, %arg2: i32, %arg3: memref<256x128xbf16, #tpu.memory_space<vmem>>, %arg4: memref<128x128xbf16, #tpu.memory_space<vmem>>, %arg5: memref<1x128xf32, #tpu.memory_space<vmem>>, %arg6: memref<1x128xf32, #tpu.memory_space<vmem>>, %arg7: memref<256x128xbf16, #tpu.memory_space<vmem>>, %arg8: memref<1x1x2x128xf32, #tpu.memory_space<vmem>>) attributes {dimension_semantics = [#tpu.dimension_semantics<parallel>, #tpu.dimension_semantics<parallel>, #tpu.dimension_semantics<arbitrary>], iteration_bounds = array<i64: 2, 1, 1>, scalar_prefetch = 0 : i64, scratch_operands = 0 : i64, tpu.core_type = #tpu.core_type<tc>, window_params = [{transform_indices = @transform_0, window_bounds = array<i64: 256, 128>}, {pipeline_mode = #tpu.pipeline_mode<synchronous>, transform_indices = @transform_1, window_bounds = array<i64: 128, 128>}, {transform_indices = @transform_2, window_bounds = array<i64: 1, 128>}, {transform_indices = @transform_3, window_bounds = array<i64: 1, 128>}, {transform_indices = @transform_4, window_bounds = array<i64: 256, 128>}, {transform_indices = @transform_5, window_bounds = array<i64: 1, 1, 2, 128>}]} {
    %c0 = arith.constant 0 : index
    %c0_0 = arith.constant 0 : index
    %0 = vector.load %arg3[%c0, %c0_0] : memref<256x128xbf16, #tpu.memory_space<vmem>>, vector<256x128xbf16>
    %1 = arith.extf %0 : vector<256x128xbf16> to vector<256x128xf32>
    %c0_1 = arith.constant 0 : index
    %c0_2 = arith.constant 0 : index
    %2 = vector.load %arg5[%c0_1, %c0_2] : memref<1x128xf32, #tpu.memory_space<vmem>>, vector<1x128xf32>
    %3 = vector.broadcast %2 : vector<1x128xf32> to vector<256x128xf32>
    %4 = arith.mulf %1, %3 : vector<256x128xf32>
    %c0_3 = arith.constant 0 : index
    %c0_4 = arith.constant 0 : index
    %5 = vector.load %arg6[%c0_3, %c0_4] : memref<1x128xf32, #tpu.memory_space<vmem>>, vector<1x128xf32>
    %6 = vector.broadcast %5 : vector<1x128xf32> to vector<256x128xf32>
    %7 = arith.addf %4, %6 : vector<256x128xf32>
    %cst = arith.constant 0.000000e+00 : f32
    %8 = vector.broadcast %cst : f32 to vector<256x128xf32>
    %9 = arith.maximumf %7, %8 : vector<256x128xf32>
    %10 = arith.truncf %9 : vector<256x128xf32> to vector<256x128xbf16>
    %c0_5 = arith.constant 0 : index
    %c0_6 = arith.constant 0 : index
    %11 = vector.load %arg4[%c0_5, %c0_6] : memref<128x128xbf16, #tpu.memory_space<vmem>>, vector<128x128xbf16>
    %cst_7 = arith.constant dense<0.000000e+00> : vector<256x128xf32>
    %12 = tpu.matmul %10, %11, %cst_7 {dimension_numbers = #tpu.dot_dimension_numbers<[1], [0], [0], [1], [0, 0, 1, 1], [], []>} : vector<256x128xbf16>, vector<128x128xbf16>, vector<256x128xf32> -> vector<256x128xf32>
    %13 = arith.truncf %12 : vector<256x128xf32> to vector<256x128xbf16>
    %c0_8 = arith.constant 0 : index
    %c0_9 = arith.constant 0 : index
    %14 = vector.load %arg7[%c0_8, %c0_9] : memref<256x128xbf16, #tpu.memory_space<vmem>>, vector<256x128xbf16>
    tpu.vector_store %arg7[%c0_8, %c0_9], %13 {strides = array<i32>} : memref<256x128xbf16, #tpu.memory_space<vmem>>, vector<256x128xbf16>,
    %cst_10 = arith.constant dense<0.000000e+00> : vector<128xf32>
    %15 = vector.multi_reduction <add>, %12, %cst_10 [0] : vector<256x128xf32> to vector<128xf32>
    %16 = vector.shape_cast %15 : vector<128xf32> to vector<1x128xf32>
    %c0_11 = arith.constant 0 : index
    %c0_12 = arith.constant 0 : index
    %c0_13 = arith.constant 0 : index
    %c0_14 = arith.constant 0 : index
    %17 = vector.load %arg8[%c0_11, %c0_12, %c0_13, %c0_14] : memref<1x1x2x128xf32, #tpu.memory_space<vmem>>, vector<1x1x1x128xf32>
    %18 = vector.shape_cast %17 : vector<1x1x1x128xf32> to vector<1x128xf32>
    %19 = vector.shape_cast %16 : vector<1x128xf32> to vector<1x1x1x128xf32>
    tpu.vector_store %arg8[%c0_11, %c0_12, %c0_13, %c0_14], %19 {strides = array<i32>} : memref<1x1x2x128xf32, #tpu.memory_space<vmem>>, vector<1x1x1x128xf32>,
    %20 = arith.mulf %12, %12 : vector<256x128xf32>
    %cst_15 = arith.constant dense<0.000000e+00> : vector<128xf32>
    %21 = vector.multi_reduction <add>, %20, %cst_15 [0] : vector<256x128xf32> to vector<128xf32>
    %22 = vector.shape_cast %21 : vector<128xf32> to vector<1x128xf32>
    %c0_16 = arith.constant 0 : index
    %c0_17 = arith.constant 0 : index
    %c1 = arith.constant 1 : index
    %c0_18 = arith.constant 0 : index
    %23 = vector.load %arg8[%c0_16, %c0_17, %c1, %c0_18] : memref<1x1x2x128xf32, #tpu.memory_space<vmem>>, vector<1x1x1x128xf32>
    %24 = vector.shape_cast %23 : vector<1x1x1x128xf32> to vector<1x128xf32>
    %25 = vector.shape_cast %22 : vector<1x128xf32> to vector<1x1x1x128xf32>
    tpu.vector_store %arg8[%c0_16, %c0_17, %c1, %c0_18], %25 {strides = array<i32>} : memref<1x1x2x128xf32, #tpu.memory_space<vmem>>, vector<1x1x1x128xf32>,
    return
  }
  func.func @transform_0(%arg0: i32, %arg1: i32, %arg2: i32) -> (i32, i32) {
    %c0_i32 = arith.constant 0 : i32
    return %arg0, %arg2 : i32, i32
  }
  func.func @transform_1(%arg0: i32, %arg1: i32, %arg2: i32) -> (i32, i32) {
    %c0_i32 = arith.constant 0 : i32
    %c0_i32_0 = arith.constant 0 : i32
    %c0_i32_1 = arith.constant 0 : i32
    return %c0_i32, %c0_i32_0 : i32, i32
  }
  func.func @transform_2(%arg0: i32, %arg1: i32, %arg2: i32) -> (i32, i32) {
    %c0_i32 = arith.constant 0 : i32
    %c0_i32_0 = arith.constant 0 : i32
    return %c0_i32, %arg2 : i32, i32
  }
  func.func @transform_3(%arg0: i32, %arg1: i32, %arg2: i32) -> (i32, i32) {
    %c0_i32 = arith.constant 0 : i32
    %c0_i32_0 = arith.constant 0 : i32
    return %c0_i32, %arg2 : i32, i32
  }
  func.func @transform_4(%arg0: i32, %arg1: i32, %arg2: i32) -> (i32, i32) {
    %c0_i32 = arith.constant 0 : i32
    return %arg0, %arg1 : i32, i32
  }
  func.func @transform_5(%arg0: i32, %arg1: i32, %arg2: i32) -> (i32, i32, i32, i32) {
    %c0_i32 = arith.constant 0 : i32
    %c0_i32_0 = arith.constant 0 : i32
    %c0_i32_1 = arith.constant 0 : i32
    return %arg0, %arg1, %c0_i32, %c0_i32_0 : i32, i32, i32, i32
  }
}

module attributes {stable_mosaic.version = 11 : i64} {
  func.func @_bn_add_bn_relu_kernel(%arg0: i32, %arg1: memref<256x128xbf16, #tpu.memory_space<vmem>>, %arg2: memref<256x128xbf16, #tpu.memory_space<vmem>>, %arg3: memref<1x128xf32, #tpu.memory_space<vmem>>, %arg4: memref<1x128xf32, #tpu.memory_space<vmem>>, %arg5: memref<1x128xf32, #tpu.memory_space<vmem>>, %arg6: memref<1x128xf32, #tpu.memory_space<vmem>>, %arg7: memref<256x128xf32, #tpu.memory_space<vmem>>) attributes {dimension_semantics = [#tpu.dimension_semantics<parallel>], iteration_bounds = array<i64: 2>, scalar_prefetch = 0 : i64, scratch_operands = 0 : i64, tpu.core_type = #tpu.core_type<tc>, window_params = [{transform_indices = @transform_0, window_bounds = array<i64: 256, 128>}, {transform_indices = @transform_1, window_bounds = array<i64: 256, 128>}, {pipeline_mode = #tpu.pipeline_mode<synchronous>, transform_indices = @transform_2, window_bounds = array<i64: 1, 128>}, {pipeline_mode = #tpu.pipeline_mode<synchronous>, transform_indices = @transform_3, window_bounds = array<i64: 1, 128>}, {pipeline_mode = #tpu.pipeline_mode<synchronous>, transform_indices = @transform_4, window_bounds = array<i64: 1, 128>}, {pipeline_mode = #tpu.pipeline_mode<synchronous>, transform_indices = @transform_5, window_bounds = array<i64: 1, 128>}, {transform_indices = @transform_6, window_bounds = array<i64: 256, 128>}]} {
    %c0 = arith.constant 0 : index
    %c0_0 = arith.constant 0 : index
    %0 = vector.load %arg1[%c0, %c0_0] : memref<256x128xbf16, #tpu.memory_space<vmem>>, vector<256x128xbf16>
    %1 = arith.extf %0 : vector<256x128xbf16> to vector<256x128xf32>
    %c0_1 = arith.constant 0 : index
    %c0_2 = arith.constant 0 : index
    %2 = vector.load %arg3[%c0_1, %c0_2] : memref<1x128xf32, #tpu.memory_space<vmem>>, vector<1x128xf32>
    %3 = vector.broadcast %2 : vector<1x128xf32> to vector<256x128xf32>
    %4 = arith.mulf %1, %3 : vector<256x128xf32>
    %c0_3 = arith.constant 0 : index
    %c0_4 = arith.constant 0 : index
    %5 = vector.load %arg4[%c0_3, %c0_4] : memref<1x128xf32, #tpu.memory_space<vmem>>, vector<1x128xf32>
    %6 = vector.broadcast %5 : vector<1x128xf32> to vector<256x128xf32>
    %7 = arith.addf %4, %6 : vector<256x128xf32>
    %c0_5 = arith.constant 0 : index
    %c0_6 = arith.constant 0 : index
    %8 = vector.load %arg2[%c0_5, %c0_6] : memref<256x128xbf16, #tpu.memory_space<vmem>>, vector<256x128xbf16>
    %9 = arith.extf %8 : vector<256x128xbf16> to vector<256x128xf32>
    %c0_7 = arith.constant 0 : index
    %c0_8 = arith.constant 0 : index
    %10 = vector.load %arg5[%c0_7, %c0_8] : memref<1x128xf32, #tpu.memory_space<vmem>>, vector<1x128xf32>
    %11 = vector.broadcast %10 : vector<1x128xf32> to vector<256x128xf32>
    %12 = arith.mulf %9, %11 : vector<256x128xf32>
    %c0_9 = arith.constant 0 : index
    %c0_10 = arith.constant 0 : index
    %13 = vector.load %arg6[%c0_9, %c0_10] : memref<1x128xf32, #tpu.memory_space<vmem>>, vector<1x128xf32>
    %14 = vector.broadcast %13 : vector<1x128xf32> to vector<256x128xf32>
    %15 = arith.addf %12, %14 : vector<256x128xf32>
    %16 = arith.addf %7, %15 : vector<256x128xf32>
    %cst = arith.constant 0.000000e+00 : f32
    %17 = vector.broadcast %cst : f32 to vector<256x128xf32>
    %18 = arith.maximumf %16, %17 : vector<256x128xf32>
    %c0_11 = arith.constant 0 : index
    %c0_12 = arith.constant 0 : index
    %19 = vector.load %arg7[%c0_11, %c0_12] : memref<256x128xf32, #tpu.memory_space<vmem>>, vector<256x128xf32>
    tpu.vector_store %arg7[%c0_11, %c0_12], %18 {strides = array<i32>} : memref<256x128xf32, #tpu.memory_space<vmem>>, vector<256x128xf32>,
    return
  }
  func.func @transform_0(%arg0: i32) -> (i32, i32) {
    %c0_i32 = arith.constant 0 : i32
    %c0_i32_0 = arith.constant 0 : i32
    return %arg0, %c0_i32 : i32, i32
  }
  func.func @transform_1(%arg0: i32) -> (i32, i32) {
    %c0_i32 = arith.constant 0 : i32
    %c0_i32_0 = arith.constant 0 : i32
    return %arg0, %c0_i32 : i32, i32
  }
  func.func @transform_2(%arg0: i32) -> (i32, i32) {
    %c0_i32 = arith.constant 0 : i32
    %c0_i32_0 = arith.constant 0 : i32
    %c0_i32_1 = arith.constant 0 : i32
    return %c0_i32, %c0_i32_0 : i32, i32
  }
  func.func @transform_3(%arg0: i32) -> (i32, i32) {
    %c0_i32 = arith.constant 0 : i32
    %c0_i32_0 = arith.constant 0 : i32
    %c0_i32_1 = arith.constant 0 : i32
    return %c0_i32, %c0_i32_0 : i32, i32
  }
  func.func @transform_4(%arg0: i32) -> (i32, i32) {
    %c0_i32 = arith.constant 0 : i32
    %c0_i32_0 = arith.constant 0 : i32
    %c0_i32_1 = arith.constant 0 : i32
    return %c0_i32, %c0_i32_0 : i32, i32
  }
  func.func @transform_5(%arg0: i32) -> (i32, i32) {
    %c0_i32 = arith.constant 0 : i32
    %c0_i32_0 = arith.constant 0 : i32
    %c0_i32_1 = arith.constant 0 : i32
    return %c0_i32, %c0_i32_0 : i32, i32
  }
  func.func @transform_6(%arg0: i32) -> (i32, i32) {
    %c0_i32 = arith.constant 0 : i32
    %c0_i32_0 = arith.constant 0 : i32
    return %arg0, %c0_i32 : i32, i32
  }
}

</mosaic_0001>

<bundles_post_ra>
// kernel: tile.13
= control target key start
LH: loop header
LB: loop body
LE: loop exit
PB: predicated region body
PF: predicated region fallthrough
CT: control target
= control target key end

     0   :  { %s28_s0 = inlined_call_operand.vmem [shape: f32[8], index: 0, kind: input, shape index: {}]   ;;  %s29_s1 = inlined_call_operand.vmem [shape: f32[9,8], index: 1, kind: output, shape index: {}]  }
   0x1   :  { %v4_v0 = vld [vmem:[%s28_s0] ss:$0 sm:$0xff] }
   0x2   :  { %5 = vst [vmem:[%s29_s1] sm:$0xff] %v4_v0  ;;  %8 = vst [vmem:[%s29_s1 + $0x8] sm:$0xff] %v4_v0 }

// kernel: tile.18
= control target key start
LH: loop header
LB: loop body
LE: loop exit
PB: predicated region body
PF: predicated region fallthrough
CT: control target
= control target key end

     0   :  { %s77_s10 = smov 64   ;;  %s78_s11 = smov 48   ;;  %vm3_vm0 = vcmask 64512   ;;  %vm9_vm1 = vcmask 589312   ;;  %vm15_vm2 = vcmask 523712   ;;  %vm21_vm3 = vcmask 458112   ;;  %s125_s0 = inlined_call_operand.vmem [shape: f32[9,8], index: 0, kind: input, shape index: {}]   ;;  %s126_s1 = inlined_call_operand.vmem [shape: f32[1,72], index: 1, kind: output, shape index: {}]  }
   0x1   :  { %v61_v0 = vld [vmem:[%s125_s0 + $0x8] sm:$0x1]   ;;  %v63_v1 = vld [vmem:[%s125_s0 + $0x6] sm:$0x1]   ;;  %v62_v2 = vld [vmem:[%s125_s0 + $0x7] sm:$0x1]  }
   0x2   :  { %7 = vrot.lane.b32.xlu0 %v61_v0, %s77_s10  ;;  %19 = vrot.lane.b32.xlu1 %v63_v1, %s78_s11  ;;  %v64_v3 = vld [vmem:[%s125_s0 + $0x5] sm:$0x1]   ;;  %v2_v4 = vld [vmem:[%s125_s0] sm:$0x1]   ;;  %s79_s18 = smov 56   ;;  %s80_s19 = smov 40  }
   0x3   :  { %4 = vst.msk [vmem:[#allocation0] sm:$0x1] %vm3_vm0, %v2_v4   ;;  %v65_v5 = vld [vmem:[%s125_s0 + $0x4] sm:$0x1]   ;;  %v66_v6 = vld [vmem:[%s125_s0 + $0x3] sm:$0x1]  }
   0x4   :  { %s81_s24 = smov 32   ;;  %s82_s25 = smov 24   ;;  %v67_v7 = vld [vmem:[%s125_s0 + $0x2] sm:$0x1]   ;;  %v68_v8 = vld [vmem:[%s125_s0 + $0x1] sm:$0x1]  }
   0x5   :  { %s83_s0 = smov 16   ;;  %s84_s30 = smov 8   ;;  %vm27_vm4 = vcmask 392512   ;;  %vm33_vm5 = vcmask 326912   ;;  %vm39_vm6 = vcmask 261312   ;;  %vm45_vm7 = vcmask 195712  }
   0x6   :  { %13 = vrot.lane.b32.xlu0 %v62_v2, %s79_s18  ;;  %25 = vrot.lane.b32.xlu1 %v64_v3, %s80_s19  ;;  %vm51_vm8 = vcmask 130112  }
   0xa   :  { %31 = vrot.lane.b32.xlu0 %v65_v5, %s81_s24  ;;  %37 = vrot.lane.b32.xlu1 %v66_v6, %s82_s25 }
   0xe   :  { %43 = vrot.lane.b32.xlu0 %v67_v7, %s83_s0  ;;  %49 = vrot.lane.b32.xlu1 %v68_v8, %s84_s30 }
  0x74   :  { %v8_v9 = vpop.permute.xlu0 %7   ;;  %v20_v10 = vpop.permute.xlu1 %19  }
  0x75   :  { %10 = vst.msk [vmem:[#allocation0] sm:$0x1] %vm9_vm1, %v8_v9  }
  0x78   :  { %v14_v11 = vpop.permute.xlu0 %13   ;;  %v26_v12 = vpop.permute.xlu1 %25  }
  0x79   :  { %16 = vst.msk [vmem:[#allocation0] sm:$0x1] %vm15_vm2, %v14_v11  }
  0x7a   :  { %22 = vst.msk [vmem:[#allocation0] sm:$0x1] %vm21_vm3, %v20_v10  }
  0x7b   :  { %28 = vst.msk [vmem:[#allocation0] sm:$0x1] %vm27_vm4, %v26_v12  }
  0x7c   :  { %v32_v13 = vpop.permute.xlu0 %31   ;;  %v38_v14 = vpop.permute.xlu1 %37  }
  0x7d   :  { %34 = vst.msk [vmem:[#allocation0] sm:$0x1] %vm33_vm5, %v32_v13  }
  0x7e   :  { %40 = vst.msk [vmem:[#allocation0] sm:$0x1] %vm39_vm6, %v38_v14  }
  0x80   :  { %v44_v15 = vpop.permute.xlu0 %43   ;;  %v50_v16 = vpop.permute.xlu1 %49  }
  0x81   :  { %46 = vst.msk [vmem:[#allocation0] sm:$0x1] %vm45_vm7, %v44_v15  }
  0x82   :  { %52 = vst.msk [vmem:[#allocation0] sm:$0x1] %vm51_vm8, %v50_v16  }
  0x89   :  { %v57_v17 = vld [vmem:[#allocation0] sm:$0x1] }
  0x8a   :  { %60 = vst [vmem:[%s126_s1] sm:$0x1] %v57_v17 }

// kernel: residual_block_forward.4
= control target key start
LH: loop header
LB: loop body
LE: loop exit
PB: predicated region body
PF: predicated region fallthrough
CT: control target
= control target key end

     0   :  { %s1350_s12 = smov 0   ;;  %s1352_s13 = smov 0   ;;  %s1548_s0 = inlined_call_operand.vmem [shape: bf16[512,128], index: 0, kind: input, shape index: {}]   ;;  %s1549_s1 = inlined_call_operand.vmem [shape: bf16[128,128], index: 1, kind: input, shape index: {}]   ;;  %s1550_s2 = inlined_call_operand.vmem [shape: bf16[512,128], index: 2, kind: output, shape index: {0}]   ;;  %s1551_s3 = inlined_call_operand.vmem [shape: f32[2,1,2,128], index: 3, kind: output, shape index: {1}]  }
   0x1   :  { %s1354_s14 = smov 0  }
   0x2 LB: > { %s33_s15 = sadd.s32 1, %s1324_s13  ;;  %p979_p0 = scmp.ge.s32.totalorder %s1328_s14, 1  ;;  %s1328_s14 = sphi %s1354_s14, %s14_s14   ;;  %s1324_s13 = sphi %s1352_s13, %s1553_s13   ;;  %s1320_s12 = sphi %s1350_s12, %s1552_s12  }
   0x3   : > { %p35_p1 = scmp.ge.s32.totalorder %s33_s15, 2  ;;  %p169_p2 = scmp.lt.s32.totalorder %s1328_s14, 3 }
   0x5   : > { %s1555_s15 = smov (%p35_p1, %s33_s15), 0  ;;  %p170_p3 = pnand %p979_p0, %p169_p2 }
   0x6   : > { %s980_s18 = sshll.u32 (!%p170_p3), %s1320_s12, 5  ;;  %p224_p5 = scmp.lt.s32.totalorder (!%p170_p3), %s1320_s12, 1 }
   0x7   : > { %173 = sbr.rel (%p170_p3) target bundleno = 321 (0x141), region = 28  ;;  %p207_p4 = scmp.lt.s32.totalorder (!%p170_p3), %s980_s18, 63 }
   0xc   : > { %v1282_v0 = vld [vmem:[%s1549_s1 + $0x38] sm:$0xff]   ;;  %v1283_v1 = vld [vmem:[%s1549_s1 + $0x30] sm:$0xff]   ;;  %s1557_s18 = smov (!%p207_p4, %s980_s18), 63  ;;  %v1284_v2 = vld [vmem:[%s1549_s1 + $0x28] sm:$0xff]   ;;  %s1559_s12 = smov (!%p224_p5, %s1320_s12), 1 }
   0xd   : > { %1194 = vmatprep.subr.bf16.mxu0 %v1282_v0  ;;  %1242 = vmatprep.subr.bf16.mxu1 %v1282_v0  ;;  %s981_s23 = sshll.u32 %s1557_s18, 2  ;;  %v1285_v3 = vld [vmem:[%s1549_s1 + $0x20] sm:$0xff]   ;;  %v1286_v5 = vld [vmem:[%s1549_s1 + $0x18] sm:$0xff]   ;;  %v1287_v6 = vld [vmem:[%s1549_s1 + $0x10] sm:$0xff]   ;;  %s984_s17 = sshll.u32 %s1559_s12, 1 }
   0xe   : > { %1195 = vmatpush3.bf16.msra.mxu0 %v1282_v0  ;;  %1250 = vmatpush3.bf16.msra.mxu1 %v1282_v0  ;;  %s1388_s26 = scalar_lea.vmem %s1548_s0, %s981_s23  ;;  %v1288_v8 = vld [vmem:[%s1549_s1 + $0x8] sm:$0xff]   ;;  %v1289_v9 = vld [vmem:[%s1549_s1] sm:$0xff]   ;;  %s1430_s16 = scalar_lea.vmem %s1550_s2, %s981_s23 }
   0xf   : > { %1196 = vmatprep.subr.bf16.mxu0 %v1283_v1  ;;  %1243 = vmatprep.subr.bf16.mxu1 %v1283_v1  ;;  %v1290_v4 = vld [vmem:[%s1388_s26] sm:$0xff]   ;;  %v1291_v10 = vld [vmem:[%s1388_s26 + $0x8] sm:$0xff]   ;;  %v1292_v12 = vld [vmem:[%s1388_s26 + $0x10] sm:$0xff]   ;;  %s230_s20 = scalar_lea.vmem %s1551_s3, %s984_s17 }
  0x10   : > { %1210 = vmatprep.mubr.bf16.mxu0 %v1290_v4  ;;  %v1298_v7 = vld [vmem:[%s1388_s26 + $0x40] sm:$0xff]   ;;  %v1299_v11 = vld [vmem:[%s1388_s26 + $0x48] sm:$0xff]   ;;  %v1300_v13 = vld [vmem:[%s1388_s26 + $0x50] sm:$0xff]  }
  0x11   : > { %1226 = vmatprep.mubr.bf16.mxu1 %v1298_v7  ;;  %v1293_v14 = vld [vmem:[%s1388_s26 + $0x18] sm:$0xff]   ;;  %v1294_v16 = vld [vmem:[%s1388_s26 + $0x20] sm:$0xff]   ;;  %v1295_v18 = vld [vmem:[%s1388_s26 + $0x28] sm:$0xff]  }
  0x12   : > { %1197 = vmatpush3.bf16.msra.mxu0 %v1283_v1  ;;  %1251 = vmatpush3.bf16.msra.mxu1 %v1283_v1  ;;  %v1301_v15 = vld [vmem:[%s1388_s26 + $0x58] sm:$0xff]   ;;  %v1302_v17 = vld [vmem:[%s1388_s26 + $0x60] sm:$0xff]   ;;  %v1303_v19 = vld [vmem:[%s1388_s26 + $0x68] sm:$0xff]  }
  0x13   : > { %1198 = vmatprep.subr.bf16.mxu0 %v1284_v2  ;;  %1244 = vmatprep.subr.bf16.mxu1 %v1284_v2  ;;  %v1296_v20 = vld [vmem:[%s1388_s26 + $0x30] sm:$0xff]   ;;  %v1297_v22 = vld [vmem:[%s1388_s26 + $0x38] sm:$0xff]  }
  0x14   : > { %v1304_v21 = vld [vmem:[%s1388_s26 + $0x70] sm:$0xff]   ;;  %v1305_v23 = vld [vmem:[%s1388_s26 + $0x78] sm:$0xff]  }
  0x16   : > { %1199 = vmatpush3.bf16.msra.mxu0 %v1284_v2  ;;  %1252 = vmatpush3.bf16.msra.mxu1 %v1284_v2 }
  0x17   : > { %1200 = vmatprep.subr.bf16.mxu0 %v1285_v3  ;;  %1245 = vmatprep.subr.bf16.mxu1 %v1285_v3 }
  0x1a   : > { %1201 = vmatpush3.bf16.msra.mxu0 %v1285_v3  ;;  %1253 = vmatpush3.bf16.msra.mxu1 %v1285_v3 }
  0x1b   : > { %1202 = vmatprep.subr.bf16.mxu0 %v1286_v5  ;;  %1246 = vmatprep.subr.bf16.mxu1 %v1286_v5 }
  0x1e   : > { %1203 = vmatpush3.bf16.msra.mxu0 %v1286_v5  ;;  %1254 = vmatpush3.bf16.msra.mxu1 %v1286_v5 }
  0x1f   : > { %1204 = vmatprep.subr.bf16.mxu0 %v1287_v6  ;;  %1247 = vmatprep.subr.bf16.mxu1 %v1287_v6 }
  0x22   : > { %1205 = vmatpush3.bf16.msra.mxu0 %v1287_v6  ;;  %1255 = vmatpush3.bf16.msra.mxu1 %v1287_v6 }
  0x23   : > { %1206 = vmatprep.subr.bf16.mxu0 %v1288_v8  ;;  %1248 = vmatprep.subr.bf16.mxu1 %v1288_v8 }
  0x26   : > { %1207 = vmatpush3.bf16.msra.mxu0 %v1288_v8  ;;  %1256 = vmatpush3.bf16.msra.mxu1 %v1288_v8 }
  0x27   : > { %1208 = vmatprep.subr.bf16.mxu0 %v1289_v9  ;;  %1249 = vmatprep.subr.bf16.mxu1 %v1289_v9 }
  0x2a   : > { %1209 = vmatpush3.bf16.msra.mxu0 %v1289_v9  ;;  %1257 = vmatpush3.bf16.msra.mxu1 %v1289_v9 }
  0x2d   : > { %1211 = vmatmul.mubr.bf16.vlgmr.msra.gmra.mxu0 %v1291_v10  ;;  %1227 = vmatmul.mubr.bf16.vlgmr.msra.gmra.mxu1 %v1299_v11 }
  0x2e   : > { %1214 = vmatprep.mubr.bf16.mxu0 %v1292_v12  ;;  %1230 = vmatprep.mubr.bf16.mxu1 %v1300_v13 }
  0x35   : > { %1215 = vmatmul.mubr.bf16.gmra.mxu0 %v1293_v14  ;;  %1231 = vmatmul.mubr.bf16.gmra.mxu1 %v1301_v15 }
  0x36   : > { %1218 = vmatprep.mubr.bf16.mxu0 %v1294_v16  ;;  %1234 = vmatprep.mubr.bf16.mxu1 %v1302_v17 }
  0x3d   : > { %1219 = vmatmul.mubr.bf16.gmra.mxu0 %v1295_v18  ;;  %1235 = vmatmul.mubr.bf16.gmra.mxu1 %v1303_v19 }
  0x3e   : > { %1222 = vmatprep.mubr.bf16.mxu0 %v1296_v20  ;;  %1238 = vmatprep.mubr.bf16.mxu1 %v1304_v21 }
  0x45   : > { %1223 = vmatmul.mubr.bf16.gmra.mxu0 %v1297_v22  ;;  %1239 = vmatmul.mubr.bf16.gmra.mxu1 %v1305_v23 }
  0xed   : > { %v1212_v24 = vpop.f32.mrf.mxu0  ;;  %v1421_v25 = vpop.f32.mrf.mxu1 }
  0xee   : > { %v785_v41 = vmul.f32 %v1212_v24, %v1212_v24 }
  0xef   : > { %v458_v26 = vpop.f32.mrf.mxu0  ;;  %v1423_v27 = vpop.f32.mrf.mxu1 }
  0xf0   : > { %v783_v32 = vmul.f32 %v458_v26, %v458_v26 }
  0xf1   : > { %v1213_v28 = vpop.f32.mrf.mxu0  ;;  %v1432_v29 = vpop.f32.mrf.mxu1 }
  0xf2   : > { %v1083_v30 = vpack.c.bf16 %v1213_v28, %v1212_v24  ;;  %v1123_v31 = vpack.c.bf16 %v1432_v29, %v1421_v25  ;;  %v786_v46 = vmul.f32 %v1213_v28, %v1213_v28 }
  0xf3   : > { %v461_v33 = vpop.f32.mrf.mxu0  ;;  %v1436_v34 = vpop.f32.mrf.mxu1 }
  0xf4   : > { %1155 = vst [vmem:[%s1430_s16 + $0x8] sm:$0xff] %v1083_v30   ;;  %v1078_v35 = vpack.c.bf16 %v461_v33, %v458_v26  ;;  %v745_v36 = vadd.f32 %v461_v33, %v458_v26  ;;  %v784_v37 = vmul.f32 %v461_v33, %v461_v33  ;;  %1163 = vst [vmem:[%s1430_s16 + $0x48] sm:$0xff] %v1123_v31  }
  0xf5   : > { %v1118_v38 = vpack.c.bf16 %v1436_v34, %v1423_v27  ;;  %v1216_v39 = vpop.f32.mrf.mxu0  ;;  %v1442_v40 = vpop.f32.mrf.mxu1 }
  0xf6   : > { %1079 = vst [vmem:[%s1430_s16] sm:$0xff] %v1078_v35   ;;  %v746_v42 = vadd.f32 %v1212_v24, %v745_v36  ;;  %v815_v43 = vadd.f32 %v784_v37, %v783_v32  ;;  %v789_v1 = vmul.f32 %v1216_v39, %v1216_v39 }
  0xf7   : > { %1162 = vst [vmem:[%s1430_s16 + $0x40] sm:$0xff] %v1118_v38   ;;  %v474_v44 = vpop.f32.mrf.mxu0  ;;  %v1446_v45 = vpop.f32.mrf.mxu1 }
  0xf8   : > { %v816_v47 = vadd.f32 %v815_v43, %v785_v41  ;;  %v747_v48 = vadd.f32 %v1213_v28, %v746_v42  ;;  %v787_v52 = vmul.f32 %v474_v44, %v474_v44 }
  0xf9   : > { %v1217_v49 = vpop.f32.mrf.mxu0  ;;  %v1448_v50 = vpop.f32.mrf.mxu1 }
  0xfa   : > { %v748_v51 = vadd.f32 %v747_v48, %v474_v44  ;;  %v817_v53 = vadd.f32 %v816_v47, %v786_v46  ;;  %v1093_v54 = vpack.c.bf16 %v1217_v49, %v1216_v39  ;;  %v1133_v56 = vpack.c.bf16 %v1448_v50, %v1442_v40 }
  0xfb   : > { %v477_v55 = vpop.f32.mrf.mxu0  ;;  %v1452_v57 = vpop.f32.mrf.mxu1  ;;  %v790_v6 = vmul.f32 %v1217_v49, %v1217_v49 }
  0xfc   : > { %v818_v58 = vadd.f32 %v817_v53, %v787_v52  ;;  %1157 = vst [vmem:[%s1430_s16 + $0x18] sm:$0xff] %v1093_v54   ;;  %v1088_v59 = vpack.c.bf16 %v477_v55, %v474_v44  ;;  %v749_v60 = vadd.f32 %v748_v51, %v477_v55  ;;  %v788_v61 = vmul.f32 %v477_v55, %v477_v55 }
  0xfd   : > { %v1220_v62 = vpop.f32.mrf.mxu0  ;;  %1165 = vst [vmem:[%s1430_s16 + $0x58] sm:$0xff] %v1133_v56   ;;  %v1128_v63 = vpack.c.bf16 %v1452_v57, %v1446_v45  ;;  %v1458_v0 = vpop.f32.mrf.mxu1 }
  0xfe   : > { %1156 = vst [vmem:[%s1430_s16 + $0x10] sm:$0xff] %v1088_v59   ;;  %v750_v2 = vadd.f32 %v1216_v39, %v749_v60  ;;  %v819_v3 = vadd.f32 %v818_v58, %v788_v61  ;;  %v793_v26 = vmul.f32 %v1220_v62, %v1220_v62  ;;  %v799_v61 = vmul.f32 %v1423_v27, %v1423_v27 }
  0xff   : > { %v490_v4 = vpop.f32.mrf.mxu0  ;;  %1164 = vst [vmem:[%s1430_s16 + $0x50] sm:$0xff] %v1128_v63   ;;  %v1462_v5 = vpop.f32.mrf.mxu1 }
 0x100   : > { %v820_v7 = vadd.f32 %v819_v3, %v789_v1  ;;  %v751_v8 = vadd.f32 %v1217_v49, %v750_v2  ;;  %v791_v12 = vmul.f32 %v490_v4, %v490_v4  ;;  %v800_v2 = vmul.f32 %v1436_v34, %v1436_v34 }
 0x101   : > { %v1221_v9 = vpop.f32.mrf.mxu0  ;;  %v1464_v10 = vpop.f32.mrf.mxu1 }
 0x102   : > { %v752_v11 = vadd.f32 %v751_v8, %v490_v4  ;;  %v821_v13 = vadd.f32 %v820_v7, %v790_v6  ;;  %v1103_v14 = vpack.c.bf16 %v1221_v9, %v1220_v62  ;;  %v1143_v16 = vpack.c.bf16 %v1464_v10, %v1458_v0 }
 0x103   : > { %v493_v15 = vpop.f32.mrf.mxu0  ;;  %v1468_v17 = vpop.f32.mrf.mxu1  ;;  %v794_v33 = vmul.f32 %v1221_v9, %v1221_v9  ;;  %v802_v8 = vmul.f32 %v1432_v29, %v1432_v29 }
 0x104   : > { %v822_v18 = vadd.f32 %v821_v13, %v791_v12  ;;  %1159 = vst [vmem:[%s1430_s16 + $0x28] sm:$0xff] %v1103_v14   ;;  %v1098_v19 = vpack.c.bf16 %v493_v15, %v490_v4  ;;  %v753_v20 = vadd.f32 %v752_v11, %v493_v15  ;;  %v792_v21 = vmul.f32 %v493_v15, %v493_v15 }
 0x105   : > { %v1224_v22 = vpop.f32.mrf.mxu0  ;;  %1167 = vst [vmem:[%s1430_s16 + $0x68] sm:$0xff] %v1143_v16   ;;  %v1138_v23 = vpack.c.bf16 %v1468_v17, %v1462_v5  ;;  %v1474_v24 = vpop.f32.mrf.mxu1  ;;  %v801_v4 = vmul.f32 %v1421_v25, %v1421_v25  ;;  %v803_v12 = vmul.f32 %v1446_v45, %v1446_v45  ;;  %v804_v15 = vmul.f32 %v1452_v57, %v1452_v57 }
 0x106   : > { %1158 = vst [vmem:[%s1430_s16 + $0x20] sm:$0xff] %v1098_v19   ;;  %v754_v28 = vadd.f32 %v1220_v62, %v753_v20  ;;  %v823_v30 = vadd.f32 %v822_v18, %v792_v21  ;;  %v797_v54 = vmul.f32 %v1224_v22, %v1224_v22  ;;  %v807_v21 = vmul.f32 %v1462_v5, %v1462_v5 }
 0x107   : > { %v506_v31 = vpop.f32.mrf.mxu0  ;;  %1166 = vst [vmem:[%s1430_s16 + $0x60] sm:$0xff] %v1138_v23   ;;  %v1478_v32 = vpop.f32.mrf.mxu1 }
 0x108   : > { %v824_v35 = vadd.f32 %v823_v30, %v793_v26  ;;  %v755_v36 = vadd.f32 %v1221_v9, %v754_v28  ;;  %v795_v41 = vmul.f32 %v506_v31, %v506_v31  ;;  %v808_v26 = vmul.f32 %v1468_v17, %v1468_v17 }
 0x109   : > { %v1225_v37 = vpop.f32.mrf.mxu0  ;;  %v1480_v38 = vpop.f32.mrf.mxu1 }
 0x10a   : > { %v756_v39 = vadd.f32 %v755_v36, %v506_v31  ;;  %v825_v42 = vadd.f32 %v824_v35, %v794_v33  ;;  %v1113_v43 = vpack.c.bf16 %v1225_v37, %v1224_v22  ;;  %v1153_v46 = vpack.c.bf16 %v1480_v38, %v1474_v24 }
 0x10b   : > { %v509_v44 = vpop.f32.mrf.mxu0  ;;  %v573_v47 = vpop.f32.mrf.mxu1  ;;  %v798_v58 = vmul.f32 %v1225_v37, %v1225_v37  ;;  %v811_v35 = vmul.f32 %v1478_v32, %v1478_v32 }
 0x10c   : > { %v826_v48 = vadd.f32 %v825_v42, %v795_v41  ;;  %1161 = vst [vmem:[%s1430_s16 + $0x38] sm:$0xff] %v1113_v43   ;;  %v1108_v49 = vpack.c.bf16 %v509_v44, %v506_v31  ;;  %v757_v51 = vadd.f32 %v756_v39, %v509_v44  ;;  %v796_v52 = vmul.f32 %v509_v44, %v509_v44 }
 0x10d   : > { %1169 = vst [vmem:[%s1430_s16 + $0x78] sm:$0xff] %v1153_v46   ;;  %v1148_v53 = vpack.c.bf16 %v573_v47, %v1478_v32  ;;  %v812_v39 = vmul.f32 %v573_v47, %v573_v47  ;;  %v814_v43 = vmul.f32 %v1480_v38, %v1480_v38 }
 0x10e   : > { %1160 = vst [vmem:[%s1430_s16 + $0x30] sm:$0xff] %v1108_v49   ;;  %v758_v55 = vadd.f32 %v1224_v22, %v757_v51  ;;  %v827_v56 = vadd.f32 %v826_v48, %v796_v52 }
 0x10f   : > { %1168 = vst [vmem:[%s1430_s16 + $0x70] sm:$0xff] %v1148_v53  }
 0x110   : > { %v759_v59 = vadd.f32 %v1225_v37, %v758_v55  ;;  %v828_v60 = vadd.f32 %v827_v56, %v797_v54 }
 0x112   : > { %v829_v62 = vadd.f32 %v828_v60, %v798_v58  ;;  %v760_v63 = vadd.f32 %v759_v59, %v1423_v27 }
 0x114   : > { %v761_v1 = vadd.f32 %v760_v63, %v1436_v34  ;;  %v830_v3 = vadd.f32 %v829_v62, %v799_v61 }
 0x116   : > { %v762_v6 = vadd.f32 %v1421_v25, %v761_v1  ;;  %v831_v7 = vadd.f32 %v830_v3, %v800_v2  ;;  %v805_v25 = vmul.f32 %v1442_v40, %v1442_v40 }
 0x118   : > { %v832_v9 = vadd.f32 %v831_v7, %v801_v4  ;;  %v763_v11 = vadd.f32 %v1432_v29, %v762_v6  ;;  %v806_v29 = vmul.f32 %v1448_v50, %v1448_v50 }
 0x11a   : > { %v764_v27 = vadd.f32 %v763_v11, %v1446_v45  ;;  %v833_v13 = vadd.f32 %v832_v9, %v802_v8 }
 0x11c   : > { %v834_v34 = vadd.f32 %v833_v13, %v803_v12  ;;  %v765_v14 = vadd.f32 %v764_v27, %v1452_v57 }
 0x11e   : > { %v766_v16 = vadd.f32 %v1442_v40, %v765_v14  ;;  %v835_v18 = vadd.f32 %v834_v34, %v804_v15  ;;  %v809_v40 = vmul.f32 %v1458_v0, %v1458_v0 }
 0x120   : > { %v836_v19 = vadd.f32 %v835_v18, %v805_v25  ;;  %v767_v20 = vadd.f32 %v1448_v50, %v766_v16  ;;  %v810_v50 = vmul.f32 %v1464_v10, %v1464_v10 }
 0x122   : > { %v768_v45 = vadd.f32 %v767_v20, %v1462_v5  ;;  %v837_v22 = vadd.f32 %v836_v19, %v806_v29 }
 0x124   : > { %v838_v23 = vadd.f32 %v837_v22, %v807_v21  ;;  %v769_v57 = vadd.f32 %v768_v45, %v1468_v17 }
 0x126   : > { %v770_v28 = vadd.f32 %v1458_v0, %v769_v57  ;;  %v839_v30 = vadd.f32 %v838_v23, %v808_v26  ;;  %v813_v0 = vmul.f32 %v1474_v24, %v1474_v24 }
 0x128   : > { %v840_v31 = vadd.f32 %v839_v30, %v809_v40  ;;  %v771_v5 = vadd.f32 %v1464_v10, %v770_v28 }
 0x12a   : > { %v772_v33 = vadd.f32 %v771_v5, %v1478_v32  ;;  %v841_v17 = vadd.f32 %v840_v31, %v810_v50 }
 0x12c   : > { %v842_v36 = vadd.f32 %v841_v17, %v811_v35  ;;  %v773_v37 = vadd.f32 %v772_v33, %v573_v47 }
 0x12e   : > { %v774_v41 = vadd.f32 %v1474_v24, %v773_v37  ;;  %v843_v42 = vadd.f32 %v842_v36, %v812_v39 }
 0x130   : > { %v775_v10 = vadd.f32 %v1480_v38, %v774_v41  ;;  %v844_v44 = vadd.f32 %v843_v42, %v813_v0 }
 0x132   : > { %v776_v46 = vrot.slane %v775_v10, 4  ;;  %v845_v48 = vadd.f32 %v844_v44, %v814_v43 }
 0x134   : > { %v777_v32 = vadd.f32 %v776_v46, %v775_v10  ;;  %v846_v49 = vrot.slane %v845_v48, 4 }
 0x136   : > { %v778_v51 = vrot.slane %v777_v32, 2  ;;  %v847_v47 = vadd.f32 %v846_v49, %v845_v48 }
 0x138   : > { %v779_v52 = vadd.f32 %v778_v51, %v777_v32  ;;  %v848_v53 = vrot.slane %v847_v47, 2 }
 0x13a   : > { %v780_v54 = vrot.slane %v779_v52, 1  ;;  %v849_v24 = vadd.f32 %v848_v53, %v847_v47 }
 0x13c   : > { %v781_v55 = vadd.f32 %v780_v54, %v779_v52  ;;  %v850_v56 = vrot.slane %v849_v24, 1 }
 0x13e   : > { %782 = vst [vmem:[%s230_s20] sm:$0x1] %v781_v55  ;;  %v851_v38 = vadd.f32 %v850_v56, %v849_v24 }
 0x140   : > { %852 = vst [vmem:[%s230_s20 + $0x1] sm:$0x1] %v851_v38 }
 0x141 PF: > { %s14_s14 = sadd.s32 1, %s1328_s14   ;;  %s1552_s12 = smov %s1324_s13 }
 0x142   : > { %p11_p6 = scmp.ge.s32.totalorder %s14_s14, 4   ;;  %s1553_s13 = smov %s1555_s15 }
 0x144   :  { %13 = sbr.rel (!%p11_p6) target bundleno = 2 (0x2), region = 70 }

// kernel: residual_block_forward.5
= control target key start
LH: loop header
LB: loop body
LE: loop exit
PB: predicated region body
PF: predicated region fallthrough
CT: control target
= control target key end

     0   :  { %s1579_s18 = smov 0   ;;  %s1581_s19 = smov 0   ;;  %s1869_s0 = inlined_call_operand.vmem [shape: bf16[512,128], index: 0, kind: input, shape index: {}]   ;;  %s1870_s1 = inlined_call_operand.vmem [shape: bf16[128,128], index: 1, kind: input, shape index: {}]   ;;  %s1871_s2 = inlined_call_operand.vmem [shape: f32[1,128], index: 2, kind: input, shape index: {}]   ;;  %s1872_s3 = inlined_call_operand.vmem [shape: f32[1,128], index: 3, kind: input, shape index: {}]   ;;  %s1873_s4 = inlined_call_operand.vmem [shape: bf16[512,128], index: 4, kind: output, shape index: {0}]   ;;  %s1874_s5 = inlined_call_operand.vmem [shape: f32[2,1,2,128], index: 5, kind: output, shape index: {1}]  }
   0x1   :  { %s1583_s20 = smov 0  }
   0x2 LB: > { %s35_s21 = sadd.s32 1, %s1543_s19  ;;  %p1149_p0 = scmp.ge.s32.totalorder %s1547_s20, 1  ;;  %s1547_s20 = sphi %s1583_s20, %s16_s20   ;;  %s1543_s19 = sphi %s1581_s19, %s1876_s19   ;;  %s1539_s18 = sphi %s1579_s18, %s1875_s18  }
   0x3   : > { %p37_p1 = scmp.ge.s32.totalorder %s35_s21, 2  ;;  %p235_p2 = scmp.lt.s32.totalorder %s1547_s20, 3 }
   0x5   : > { %s1878_s21 = smov (%p37_p1, %s35_s21), 0  ;;  %p236_p3 = pnand %p1149_p0, %p235_p2 }
   0x6   : > { %s1150_s24 = sshll.u32 (!%p236_p3), %s1539_s18, 5  ;;  %p306_p5 = scmp.lt.s32.totalorder (!%p236_p3), %s1539_s18, 1 }
   0x7   : > { %239 = sbr.rel (%p236_p3) target bundleno = 321 (0x141), region = 36  ;;  %p283_p4 = scmp.lt.s32.totalorder (!%p236_p3), %s1150_s24, 63 }
   0xc   : > { %v1517_v0 = vld [vmem:[%s1870_s1 + $0x38] sm:$0xff]   ;;  %v1518_v1 = vld [vmem:[%s1870_s1 + $0x30] sm:$0xff]   ;;  %s1880_s24 = smov (!%p283_p4, %s1150_s24), 63  ;;  %v1519_v2 = vld [vmem:[%s1870_s1 + $0x28] sm:$0xff]   ;;  %s1882_s18 = smov (!%p306_p5, %s1539_s18), 1 }
   0xd   : > { %1429 = vmatprep.subr.bf16.mxu0 %v1517_v0  ;;  %1477 = vmatprep.subr.bf16.mxu1 %v1517_v0  ;;  %s1151_s29 = sshll.u32 %s1880_s24, 2  ;;  %v1520_v3 = vld [vmem:[%s1870_s1 + $0x20] sm:$0xff]   ;;  %v1521_v21 = vld [vmem:[%s1870_s1 + $0x18] sm:$0xff]   ;;  %v1522_v35 = vld [vmem:[%s1870_s1 + $0x10] sm:$0xff]   ;;  %s1154_s24 = sshll.u32 %s1882_s18, 1 }
   0xe   : > { %1430 = vmatpush3.bf16.msra.mxu0 %v1517_v0  ;;  %1485 = vmatpush3.bf16.msra.mxu1 %v1517_v0  ;;  %s1617_s7 = scalar_lea.vmem %s1869_s0, %s1151_s29  ;;  %v1626_v5 = vld [vmem:[%s1871_s2] ss:$0 sm:$0xff]  ;;  %v1523_v50 = vld [vmem:[%s1870_s1 + $0x8] sm:$0xff]   ;;  %s1767_s30 = scalar_lea.vmem %s1873_s4, %s1151_s29 }
   0xf   : > { %1431 = vmatprep.subr.bf16.mxu0 %v1518_v1  ;;  %1478 = vmatprep.subr.bf16.mxu1 %v1518_v1  ;;  %v1232_v4 = vld [vmem:[%s1617_s7] sm:$0xff]   ;;  %v1375_v8 = vld [vmem:[%s1617_s7 + $0x8] sm:$0xff]   ;;  %v1376_v9 = vld [vmem:[%s1617_s7 + $0x10] sm:$0xff]  }
  0x10   : > { %v1233_v6 = vunpack.c.l.bf16 %v1232_v4  ;;  %v1234_v7 = vunpack.c.h.bf16 %v1232_v4  ;;  %v1377_v10 = vld [vmem:[%s1617_s7 + $0x18] sm:$0xff]   ;;  %v1634_v11 = vld [vmem:[%s1872_s3] ss:$0 sm:$0xff]  ;;  %v1237_v12 = vunpack.c.l.bf16 %v1375_v8  ;;  %v1238_v13 = vunpack.c.h.bf16 %v1375_v8  ;;  %v1379_v34 = vld [vmem:[%s1617_s7 + $0x28] sm:$0xff]  }
  0x11   : > { %v1241_v14 = vunpack.c.l.bf16 %v1376_v9  ;;  %v1242_v15 = vunpack.c.h.bf16 %v1376_v9  ;;  %v1245_v18 = vunpack.c.l.bf16 %v1377_v10  ;;  %v1246_v19 = vunpack.c.h.bf16 %v1377_v10  ;;  %v1378_v20 = vld [vmem:[%s1617_s7 + $0x20] sm:$0xff]   ;;  %v1380_v39 = vld [vmem:[%s1617_s7 + $0x30] sm:$0xff]   ;;  %v1671_v59 = vld [vmem:[%s1617_s7 + $0x38] sm:$0xff]  }
  0x12   : > { %1432 = vmatpush3.bf16.msra.mxu0 %v1518_v1  ;;  %1486 = vmatpush3.bf16.msra.mxu1 %v1518_v1  ;;  %v385_v16 = vmul.f32 %v1233_v6, %v1626_v5  ;;  %v386_v17 = vmul.f32 %v1234_v7, %v1626_v5  ;;  %v387_v22 = vmul.f32 %v1237_v12, %v1626_v5  ;;  %v1249_v30 = vunpack.c.l.bf16 %v1378_v20  ;;  %v1382_v60 = vld [vmem:[%s1617_s7 + $0x40] sm:$0xff]   ;;  %v1383_v6 = vld [vmem:[%s1617_s7 + $0x48] sm:$0xff]  }
  0x13   : > { %1433 = vmatprep.subr.bf16.mxu0 %v1519_v2  ;;  %1479 = vmatprep.subr.bf16.mxu1 %v1519_v2  ;;  %v388_v23 = vmul.f32 %v1238_v13, %v1626_v5  ;;  %v389_v24 = vmul.f32 %v1241_v14, %v1626_v5  ;;  %v390_v27 = vmul.f32 %v1242_v15, %v1626_v5  ;;  %v1250_v43 = vunpack.c.h.bf16 %v1378_v20  ;;  %v1524_v0 = vld [vmem:[%s1870_s1] sm:$0xff]  }
  0x14   : > { %v424_v25 = vadd.f32 %v1634_v11, %v385_v16  ;;  %v425_v26 = vadd.f32 %v1634_v11, %v386_v17  ;;  %v391_v28 = vmul.f32 %v1245_v18, %v1626_v5  ;;  %v392_v29 = vmul.f32 %v1246_v19, %v1626_v5  ;;  %v1384_v16 = vld [vmem:[%s1617_s7 + $0x50] sm:$0xff]  }
  0x15   : > { %v426_v33 = vadd.f32 %v1634_v11, %v387_v22  ;;  %v427_v36 = vadd.f32 %v1634_v11, %v388_v23  ;;  %v428_v37 = vadd.f32 %v1634_v11, %v389_v24  ;;  %v429_v38 = vadd.f32 %v1634_v11, %v390_v27 }
  0x16   : > { %1434 = vmatpush3.bf16.msra.mxu0 %v1519_v2  ;;  %1487 = vmatpush3.bf16.msra.mxu1 %v1519_v2  ;;  %v456_v31 = vmax.f32 %v424_v25, 0.0  ;;  %v457_v32 = vmax.f32 %v425_v26, 0.0  ;;  %v430_v41 = vadd.f32 %v1634_v11, %v391_v28  ;;  %v431_v42 = vadd.f32 %v1634_v11, %v392_v29 }
  0x17   : > { %1435 = vmatprep.subr.bf16.mxu0 %v1520_v3  ;;  %1480 = vmatprep.subr.bf16.mxu1 %v1520_v3  ;;  %v393_v44 = vmul.f32 %v1249_v30, %v1626_v5  ;;  %v1253_v45 = vunpack.c.l.bf16 %v1379_v34  ;;  %v458_v46 = vmax.f32 %v426_v33, 0.0  ;;  %v394_v47 = vmul.f32 %v1250_v43, %v1626_v5  ;;  %v1386_v30 = vld [vmem:[%s1617_s7 + $0x60] sm:$0xff]  }
  0x18   : > { %v488_v40 = vpack.c.bf16 %v457_v32, %v456_v31  ;;  %v1254_v48 = vunpack.c.h.bf16 %v1379_v34  ;;  %v1257_v49 = vunpack.c.l.bf16 %v1380_v39  ;;  %v459_v51 = vmax.f32 %v427_v36, 0.0 }
  0x19   : > { %v460_v52 = vmax.f32 %v428_v37, 0.0  ;;  %v461_v53 = vmax.f32 %v429_v38, 0.0  ;;  %v395_v54 = vmul.f32 %v1253_v45, %v1626_v5  ;;  %v462_v55 = vmax.f32 %v430_v41, 0.0 }
  0x1a   : > { %1436 = vmatpush3.bf16.msra.mxu0 %v1520_v3  ;;  %1488 = vmatpush3.bf16.msra.mxu1 %v1520_v3  ;;  %v463_v56 = vmax.f32 %v431_v42, 0.0  ;;  %v1668_v57 = vadd.f32 %v1634_v11, %v393_v44  ;;  %v1258_v58 = vunpack.c.h.bf16 %v1380_v39  ;;  %v1675_v61 = vadd.f32 %v1634_v11, %v394_v47  ;;  %v1387_v47 = vld [vmem:[%s1617_s7 + $0x68] sm:$0xff]  }
  0x1b   : > { %1437 = vmatprep.subr.bf16.mxu0 %v1521_v21  ;;  %1481 = vmatprep.subr.bf16.mxu1 %v1521_v21  ;;  %v396_v62 = vmul.f32 %v1254_v48, %v1626_v5  ;;  %v397_v63 = vmul.f32 %v1257_v49, %v1626_v5  ;;  %v489_v1 = vpack.c.bf16 %v459_v51, %v458_v46  ;;  %v1261_v3 = vunpack.c.l.bf16 %v1671_v59 }
  0x1c   : > { %1445 = vmatprep.mubr.bf16.mxu0 %v488_v40  ;;  %v1683_v2 = vadd.f32 %v1634_v11, %v395_v54  ;;  %v1265_v4 = vunpack.c.l.bf16 %v1382_v60  ;;  %v490_v7 = vpack.c.bf16 %v461_v53, %v460_v52  ;;  %v1687_v8 = vpack.c.bf16 %v463_v56, %v462_v55  ;;  %v1388_v52 = vld [vmem:[%s1617_s7 + $0x70] sm:$0xff]  }
  0x1d   : > { %v464_v9 = vmax.f32 %v1668_v57, 0.0  ;;  %v398_v10 = vmul.f32 %v1258_v58, %v1626_v5  ;;  %v465_v12 = vmax.f32 %v1675_v61, 0.0  ;;  %v1262_v13 = vunpack.c.h.bf16 %v1671_v59 }
  0x1e   : > { %1438 = vmatpush3.bf16.msra.mxu0 %v1521_v21  ;;  %1489 = vmatpush3.bf16.msra.mxu1 %v1521_v21  ;;  %v1266_v14 = vunpack.c.h.bf16 %v1382_v60  ;;  %v401_v15 = vmul.f32 %v1265_v4, %v1626_v5  ;;  %v1696_v17 = vadd.f32 %v1634_v11, %v396_v62  ;;  %v1699_v18 = vadd.f32 %v1634_v11, %v397_v63  ;;  %v1385_v21 = vld [vmem:[%s1617_s7 + $0x58] sm:$0xff]  }
  0x1f   : > { %1439 = vmatprep.subr.bf16.mxu0 %v1522_v35  ;;  %1482 = vmatprep.subr.bf16.mxu1 %v1522_v35  ;;  %v1269_v19 = vunpack.c.l.bf16 %v1383_v6  ;;  %v1270_v20 = vunpack.c.h.bf16 %v1383_v6  ;;  %v466_v22 = vmax.f32 %v1683_v2, 0.0  ;;  %v1704_v23 = vmul.f32 %v1261_v3, %v1626_v5  ;;  %v1389_v6 = vld [vmem:[%s1617_s7 + $0x78] sm:$0xff]   ;;  %s312_s7 = scalar_lea.vmem %s1874_s5, %s1154_s24 }
  0x20   : > { %v402_v24 = vmul.f32 %v1266_v14, %v1626_v5  ;;  %v440_v25 = vadd.f32 %v1634_v11, %v401_v15  ;;  %v1273_v28 = vunpack.c.l.bf16 %v1384_v16  ;;  %v1274_v29 = vunpack.c.h.bf16 %v1384_v16 }
  0x21   : > { %v403_v26 = vmul.f32 %v1269_v19, %v1626_v5  ;;  %v404_v27 = vmul.f32 %v1270_v20, %v1626_v5  ;;  %v1712_v31 = vadd.f32 %v1634_v11, %v398_v10  ;;  %v1277_v34 = vunpack.c.l.bf16 %v1385_v21 }
  0x22   : > { %1440 = vmatpush3.bf16.msra.mxu0 %v1522_v35  ;;  %1490 = vmatpush3.bf16.msra.mxu1 %v1522_v35  ;;  %v441_v32 = vadd.f32 %v1634_v11, %v402_v24  ;;  %v472_v33 = vmax.f32 %v440_v25, 0.0  ;;  %v405_v37 = vmul.f32 %v1273_v28, %v1626_v5  ;;  %v406_v38 = vmul.f32 %v1274_v29, %v1626_v5 }
  0x23   : > { %1441 = vmatprep.subr.bf16.mxu0 %v1523_v50  ;;  %1483 = vmatprep.subr.bf16.mxu1 %v1523_v50  ;;  %v442_v35 = vadd.f32 %v1634_v11, %v403_v26  ;;  %v443_v36 = vadd.f32 %v1634_v11, %v404_v27  ;;  %v1278_v40 = vunpack.c.h.bf16 %v1385_v21  ;;  %v407_v41 = vmul.f32 %v1277_v34, %v1626_v5 }
  0x24   : > { %v473_v39 = vmax.f32 %v441_v32, 0.0  ;;  %v1281_v42 = vunpack.c.l.bf16 %v1386_v30  ;;  %v444_v45 = vadd.f32 %v1634_v11, %v405_v37  ;;  %v445_v46 = vadd.f32 %v1634_v11, %v406_v38 }
  0x25   : > { %v474_v43 = vmax.f32 %v442_v35, 0.0  ;;  %v475_v44 = vmax.f32 %v443_v36, 0.0  ;;  %v408_v49 = vmul.f32 %v1278_v40, %v1626_v5  ;;  %v1282_v51 = vunpack.c.h.bf16 %v1386_v30 }
  0x26   : > { %1442 = vmatpush3.bf16.msra.mxu0 %v1523_v50  ;;  %1491 = vmatpush3.bf16.msra.mxu1 %v1523_v50  ;;  %v496_v48 = vpack.c.bf16 %v473_v39, %v472_v33  ;;  %v446_v50 = vadd.f32 %v1634_v11, %v407_v41  ;;  %v476_v54 = vmax.f32 %v444_v45, 0.0  ;;  %v477_v55 = vmax.f32 %v445_v46, 0.0 }
  0x27   : > { %1443 = vmatprep.subr.bf16.mxu0 %v1524_v0  ;;  %1484 = vmatprep.subr.bf16.mxu1 %v1524_v0  ;;  %v497_v53 = vpack.c.bf16 %v475_v44, %v474_v43  ;;  %v409_v56 = vmul.f32 %v1281_v42, %v1626_v5  ;;  %v447_v58 = vadd.f32 %v1634_v11, %v408_v49  ;;  %v1285_v63 = vunpack.c.l.bf16 %v1387_v47 }
  0x28   : > { %1461 = vmatprep.mubr.bf16.mxu1 %v496_v48  ;;  %v478_v60 = vmax.f32 %v446_v50, 0.0  ;;  %v410_v62 = vmul.f32 %v1282_v51, %v1626_v5  ;;  %v1286_v3 = vunpack.c.h.bf16 %v1387_v47  ;;  %v1289_v4 = vunpack.c.l.bf16 %v1388_v52 }
  0x29   : > { %v411_v14 = vmul.f32 %v1285_v63, %v1626_v5  ;;  %v1290_v15 = vunpack.c.h.bf16 %v1388_v52  ;;  %v492_v16 = vpack.c.bf16 %v465_v12, %v464_v9  ;;  %v400_v24 = vmul.f32 %v1262_v13, %v1626_v5 }
  0x2a   : > { %1444 = vmatpush3.bf16.msra.mxu0 %v1524_v0  ;;  %1492 = vmatpush3.bf16.msra.mxu1 %v1524_v0  ;;  %v498_v0 = vpack.c.bf16 %v477_v55, %v476_v54  ;;  %v449_v10 = vadd.f32 %v1634_v11, %v410_v62  ;;  %v412_v20 = vmul.f32 %v1286_v3, %v1626_v5  ;;  %v1293_v27 = vunpack.c.l.bf16 %v1389_v6 }
  0x2b   : > { %v413_v21 = vmul.f32 %v1289_v4, %v1626_v5  ;;  %v414_v26 = vmul.f32 %v1290_v15, %v1626_v5  ;;  %v450_v57 = vadd.f32 %v1634_v11, %v411_v14  ;;  %v1294_v9 = vunpack.c.h.bf16 %v1389_v6 }
  0x2c   : > { %v481_v25 = vmax.f32 %v449_v10, 0.0  ;;  %v451_v61 = vadd.f32 %v1634_v11, %v412_v20  ;;  %v467_v12 = vmax.f32 %v1696_v17, 0.0  ;;  %v468_v13 = vmax.f32 %v1699_v18, 0.0 }
  0x2d   : > { %1446 = vmatmul.mubr.bf16.vlgmr.msra.gmra.mxu0 %v489_v1  ;;  %1462 = vmatmul.mubr.bf16.vlgmr.msra.gmra.mxu1 %v497_v53  ;;  %v448_v1 = vadd.f32 %v1634_v11, %v409_v56  ;;  %v452_v30 = vadd.f32 %v1634_v11, %v413_v21  ;;  %v453_v59 = vadd.f32 %v1634_v11, %v414_v26  ;;  %v469_v32 = vmax.f32 %v1712_v31, 0.0 }
  0x2e   : > { %1449 = vmatprep.mubr.bf16.mxu0 %v490_v7  ;;  %v479_v7 = vmax.f32 %v447_v58, 0.0  ;;  %1465 = vmatprep.mubr.bf16.mxu1 %v498_v0  ;;  %v438_v33 = vadd.f32 %v1634_v11, %v1704_v23  ;;  %v482_v34 = vmax.f32 %v450_v57, 0.0  ;;  %v483_v35 = vmax.f32 %v451_v61, 0.0 }
  0x2f   : > { %v480_v19 = vmax.f32 %v448_v1, 0.0  ;;  %v416_v17 = vmul.f32 %v1294_v9, %v1626_v5  ;;  %v493_v36 = vpack.c.bf16 %v467_v12, %v466_v22  ;;  %v439_v37 = vadd.f32 %v1634_v11, %v400_v24 }
  0x30   : > { %v499_v28 = vpack.c.bf16 %v479_v7, %v478_v60  ;;  %v484_v38 = vmax.f32 %v452_v30, 0.0  ;;  %v485_v18 = vmax.f32 %v453_v59, 0.0  ;;  %v494_v39 = vpack.c.bf16 %v469_v32, %v468_v13 }
  0x31   : > { %v500_v29 = vpack.c.bf16 %v481_v25, %v480_v19  ;;  %v501_v31 = vpack.c.bf16 %v483_v35, %v482_v34  ;;  %v455_v23 = vadd.f32 %v1634_v11, %v416_v17  ;;  %v470_v41 = vmax.f32 %v438_v33, 0.0 }
  0x32   : > { %v471_v42 = vmax.f32 %v439_v37, 0.0  ;;  %v502_v43 = vpack.c.bf16 %v485_v18, %v484_v38 }
  0x33   : > { %v487_v2 = vmax.f32 %v455_v23, 0.0 }
  0x34   : > { %v495_v22 = vpack.c.bf16 %v471_v42, %v470_v41 }
  0x35   : > { %1450 = vmatmul.mubr.bf16.gmra.mxu0 %v1687_v8  ;;  %1466 = vmatmul.mubr.bf16.gmra.mxu1 %v499_v28  ;;  %v415_v8 = vmul.f32 %v1293_v27, %v1626_v5 }
  0x36   : > { %1453 = vmatprep.mubr.bf16.mxu0 %v492_v16  ;;  %1469 = vmatprep.mubr.bf16.mxu1 %v500_v29 }
  0x37   : > { %v454_v40 = vadd.f32 %v1634_v11, %v415_v8 }
  0x39   : > { %v486_v5 = vmax.f32 %v454_v40, 0.0 }
  0x3b   : > { %v503_v44 = vpack.c.bf16 %v487_v2, %v486_v5 }
  0x3d   : > { %1454 = vmatmul.mubr.bf16.gmra.mxu0 %v493_v36  ;;  %1470 = vmatmul.mubr.bf16.gmra.mxu1 %v501_v31 }
  0x3e   : > { %1457 = vmatprep.mubr.bf16.mxu0 %v494_v39  ;;  %1473 = vmatprep.mubr.bf16.mxu1 %v502_v43 }
  0x45   : > { %1458 = vmatmul.mubr.bf16.gmra.mxu0 %v495_v22  ;;  %1474 = vmatmul.mubr.bf16.gmra.mxu1 %v503_v44 }
  0xed   : > { %v1447_v45 = vpop.f32.mrf.mxu0  ;;  %v1760_v47 = vpop.f32.mrf.mxu1 }
  0xee   : > { %v929_v60 = vmul.f32 %v1447_v45, %v1447_v45 }
  0xef   : > { %v602_v46 = vpop.f32.mrf.mxu0  ;;  %v1769_v49 = vpop.f32.mrf.mxu1 }
  0xf0   : > { %v927_v51 = vmul.f32 %v602_v46, %v602_v46 }
  0xf1   : > { %v1448_v11 = vpop.f32.mrf.mxu0  ;;  %v1772_v55 = vpop.f32.mrf.mxu1 }
  0xf2   : > { %v1303_v48 = vpack.c.bf16 %v1448_v11, %v1447_v45  ;;  %v1343_v58 = vpack.c.bf16 %v1772_v55, %v1760_v47  ;;  %v930_v4 = vmul.f32 %v1448_v11, %v1448_v11 }
  0xf3   : > { %v605_v50 = vpop.f32.mrf.mxu0  ;;  %v1777_v0 = vpop.f32.mrf.mxu1 }
  0xf4   : > { %1390 = vst [vmem:[%s1767_s30 + $0x8] sm:$0xff] %v1303_v48   ;;  %v1298_v52 = vpack.c.bf16 %v605_v50, %v602_v46  ;;  %v889_v53 = vadd.f32 %v605_v50, %v602_v46  ;;  %v928_v54 = vmul.f32 %v605_v50, %v605_v50  ;;  %1398 = vst [vmem:[%s1767_s30 + $0x48] sm:$0xff] %v1343_v58  }
  0xf5   : > { %v1451_v56 = vpop.f32.mrf.mxu0  ;;  %v1338_v3 = vpack.c.bf16 %v1777_v0, %v1769_v49  ;;  %v1782_v10 = vpop.f32.mrf.mxu1 }
  0xf6   : > { %1299 = vst [vmem:[%s1767_s30] sm:$0xff] %v1298_v52   ;;  %v890_v62 = vadd.f32 %v1447_v45, %v889_v53  ;;  %v959_v63 = vadd.f32 %v928_v54, %v927_v51  ;;  %v933_v12 = vmul.f32 %v1451_v56, %v1451_v56 }
  0xf7   : > { %v618_v1 = vpop.f32.mrf.mxu0  ;;  %1397 = vst [vmem:[%s1767_s30 + $0x40] sm:$0xff] %v1338_v3   ;;  %v1785_v21 = vpop.f32.mrf.mxu1 }
  0xf8   : > { %v960_v6 = vadd.f32 %v959_v63, %v929_v60  ;;  %v891_v7 = vadd.f32 %v1448_v11, %v890_v62  ;;  %v931_v16 = vmul.f32 %v618_v1, %v618_v1 }
  0xf9   : > { %v1452_v14 = vpop.f32.mrf.mxu0  ;;  %v1788_v57 = vpop.f32.mrf.mxu1 }
  0xfa   : > { %v892_v15 = vadd.f32 %v891_v7, %v618_v1  ;;  %v961_v19 = vadd.f32 %v960_v6, %v930_v4  ;;  %v1313_v20 = vpack.c.bf16 %v1452_v14, %v1451_v56  ;;  %v1353_v9 = vpack.c.bf16 %v1788_v57, %v1782_v10 }
  0xfb   : > { %v621_v24 = vpop.f32.mrf.mxu0  ;;  %v1793_v59 = vpop.f32.mrf.mxu1  ;;  %v934_v33 = vmul.f32 %v1452_v14, %v1452_v14 }
  0xfc   : > { %v962_v25 = vadd.f32 %v961_v19, %v931_v16  ;;  %1392 = vst [vmem:[%s1767_s30 + $0x18] sm:$0xff] %v1313_v20   ;;  %v1308_v26 = vpack.c.bf16 %v621_v24, %v618_v1  ;;  %v893_v27 = vadd.f32 %v892_v15, %v621_v24  ;;  %v932_v28 = vmul.f32 %v621_v24, %v621_v24 }
  0xfd   : > { %v1455_v61 = vpop.f32.mrf.mxu0  ;;  %1400 = vst [vmem:[%s1767_s30 + $0x58] sm:$0xff] %v1353_v9   ;;  %v1348_v32 = vpack.c.bf16 %v1793_v59, %v1785_v21  ;;  %v1798_v8 = vpop.f32.mrf.mxu1 }
  0xfe   : > { %1391 = vst [vmem:[%s1767_s30 + $0x10] sm:$0xff] %v1308_v26   ;;  %v894_v29 = vadd.f32 %v1451_v56, %v893_v27  ;;  %v963_v30 = vadd.f32 %v962_v25, %v932_v28  ;;  %v937_v22 = vmul.f32 %v1455_v61, %v1455_v61 }
  0xff   : > { %v634_v13 = vpop.f32.mrf.mxu0  ;;  %1399 = vst [vmem:[%s1767_s30 + $0x50] sm:$0xff] %v1348_v32   ;;  %v1801_v39 = vpop.f32.mrf.mxu1  ;;  %v945_v32 = vmul.f32 %v1760_v47, %v1760_v47 }
 0x100   : > { %v964_v34 = vadd.f32 %v963_v30, %v933_v12  ;;  %v895_v35 = vadd.f32 %v1452_v14, %v894_v29  ;;  %v935_v37 = vmul.f32 %v634_v13, %v634_v13  ;;  %v944_v30 = vmul.f32 %v1777_v0, %v1777_v0 }
 0x101   : > { %v1456_v17 = vpop.f32.mrf.mxu0  ;;  %v1804_v43 = vpop.f32.mrf.mxu1 }
 0x102   : > { %v896_v36 = vadd.f32 %v895_v35, %v634_v13  ;;  %v965_v38 = vadd.f32 %v964_v34, %v934_v33  ;;  %v1323_v18 = vpack.c.bf16 %v1456_v17, %v1455_v61  ;;  %v1363_v2 = vpack.c.bf16 %v1804_v43, %v1798_v8 }
 0x103   : > { %v637_v31 = vpop.f32.mrf.mxu0  ;;  %v701_v46 = vpop.f32.mrf.mxu1  ;;  %v938_v50 = vmul.f32 %v1456_v17, %v1456_v17  ;;  %v946_v35 = vmul.f32 %v1772_v55, %v1772_v55 }
 0x104   : > { %v966_v40 = vadd.f32 %v965_v38, %v935_v37  ;;  %1394 = vst [vmem:[%s1767_s30 + $0x28] sm:$0xff] %v1323_v18   ;;  %v1318_v23 = vpack.c.bf16 %v637_v31, %v634_v13  ;;  %v897_v41 = vadd.f32 %v896_v36, %v637_v31  ;;  %v936_v42 = vmul.f32 %v637_v31, %v637_v31 }
 0x105   : > { %v1459_v5 = vpop.f32.mrf.mxu0  ;;  %1402 = vst [vmem:[%s1767_s30 + $0x68] sm:$0xff] %v1363_v2   ;;  %v1358_v48 = vpack.c.bf16 %v701_v46, %v1801_v39  ;;  %v1811_v53 = vpop.f32.mrf.mxu1  ;;  %v947_v37 = vmul.f32 %v1785_v21, %v1785_v21  ;;  %v948_v31 = vmul.f32 %v1793_v59, %v1793_v59 }
 0x106   : > { %1393 = vst [vmem:[%s1767_s30 + $0x20] sm:$0xff] %v1318_v23   ;;  %v898_v44 = vadd.f32 %v1455_v61, %v897_v41  ;;  %v967_v45 = vadd.f32 %v966_v40, %v936_v42  ;;  %v941_v16 = vmul.f32 %v1459_v5, %v1459_v5  ;;  %v943_v61 = vmul.f32 %v1769_v49, %v1769_v49 }
 0x107   : > { %v650_v11 = vpop.f32.mrf.mxu0  ;;  %1401 = vst [vmem:[%s1767_s30 + $0x60] sm:$0xff] %v1358_v48   ;;  %v714_v63 = vpop.f32.mrf.mxu1  ;;  %v954_v48 = vmul.f32 %v1804_v43, %v1804_v43 }
 0x108   : > { %v968_v51 = vadd.f32 %v967_v45, %v937_v22  ;;  %v899_v52 = vadd.f32 %v1456_v17, %v898_v44  ;;  %v939_v58 = vmul.f32 %v650_v11, %v650_v11  ;;  %v952_v44 = vmul.f32 %v701_v46, %v701_v46 }
 0x109   : > { %v1460_v54 = vpop.f32.mrf.mxu0  ;;  %v1476_v14 = vpop.f32.mrf.mxu1  ;;  %v953_v45 = vmul.f32 %v1798_v8, %v1798_v8 }
 0x10a   : > { %v900_v56 = vadd.f32 %v899_v52, %v650_v11  ;;  %v969_v60 = vadd.f32 %v968_v51, %v938_v50  ;;  %v1333_v62 = vpack.c.bf16 %v1460_v54, %v1459_v5  ;;  %v1373_v15 = vpack.c.bf16 %v1476_v14, %v1811_v53 }
 0x10b   : > { %v653_v1 = vpop.f32.mrf.mxu0  ;;  %v717_v24 = vpop.f32.mrf.mxu1  ;;  %v942_v26 = vmul.f32 %v1460_v54, %v1460_v54 }
 0x10c   : > { %v970_v3 = vadd.f32 %v969_v60, %v939_v58  ;;  %1396 = vst [vmem:[%s1767_s30 + $0x38] sm:$0xff] %v1333_v62   ;;  %v1328_v4 = vpack.c.bf16 %v653_v1, %v650_v11  ;;  %v901_v6 = vadd.f32 %v900_v56, %v653_v1  ;;  %v940_v7 = vmul.f32 %v653_v1, %v653_v1 }
 0x10d   : > { %1404 = vst [vmem:[%s1767_s30 + $0x78] sm:$0xff] %v1373_v15   ;;  %v1368_v25 = vpack.c.bf16 %v717_v24, %v714_v63  ;;  %v957_v58 = vmul.f32 %v1811_v53, %v1811_v53  ;;  %v958_v62 = vmul.f32 %v1476_v14, %v1476_v14 }
 0x10e   : > { %1395 = vst [vmem:[%s1767_s30 + $0x30] sm:$0xff] %v1328_v4   ;;  %v902_v19 = vadd.f32 %v1459_v5, %v901_v6  ;;  %v971_v20 = vadd.f32 %v970_v3, %v940_v7  ;;  %v951_v5 = vmul.f32 %v1801_v39, %v1801_v39 }
 0x10f   : > { %1403 = vst [vmem:[%s1767_s30 + $0x70] sm:$0xff] %v1368_v25  }
 0x110   : > { %v903_v27 = vadd.f32 %v1460_v54, %v902_v19  ;;  %v972_v28 = vadd.f32 %v971_v20, %v941_v16 }
 0x112   : > { %v973_v9 = vadd.f32 %v972_v28, %v942_v26  ;;  %v904_v12 = vadd.f32 %v903_v27, %v1769_v49 }
 0x114   : > { %v905_v29 = vadd.f32 %v904_v12, %v1777_v0  ;;  %v974_v13 = vadd.f32 %v973_v9, %v943_v61 }
 0x116   : > { %v906_v33 = vadd.f32 %v1760_v47, %v905_v29  ;;  %v975_v34 = vadd.f32 %v974_v13, %v944_v30  ;;  %v949_v47 = vmul.f32 %v1782_v10, %v1782_v10 }
 0x118   : > { %v976_v17 = vadd.f32 %v975_v34, %v945_v32  ;;  %v907_v36 = vadd.f32 %v1772_v55, %v906_v33  ;;  %v950_v55 = vmul.f32 %v1788_v57, %v1788_v57 }
 0x11a   : > { %v908_v49 = vadd.f32 %v907_v36, %v1785_v21  ;;  %v977_v38 = vadd.f32 %v976_v17, %v946_v35 }
 0x11c   : > { %v978_v0 = vadd.f32 %v977_v38, %v947_v37  ;;  %v909_v18 = vadd.f32 %v908_v49, %v1793_v59 }
 0x11e   : > { %v910_v40 = vadd.f32 %v1782_v10, %v909_v18  ;;  %v979_v23 = vadd.f32 %v978_v0, %v948_v31 }
 0x120   : > { %v980_v41 = vadd.f32 %v979_v23, %v949_v47  ;;  %v911_v42 = vadd.f32 %v1788_v57, %v910_v40 }
 0x122   : > { %v912_v21 = vadd.f32 %v911_v42, %v1801_v39  ;;  %v981_v2 = vadd.f32 %v980_v41, %v950_v55  ;;  %v955_v39 = vmul.f32 %v714_v63, %v714_v63 }
 0x124   : > { %v982_v22 = vadd.f32 %v981_v2, %v951_v5  ;;  %v913_v59 = vadd.f32 %v912_v21, %v701_v46  ;;  %v956_v46 = vmul.f32 %v717_v24, %v717_v24 }
 0x126   : > { %v914_v10 = vadd.f32 %v1798_v8, %v913_v59  ;;  %v983_v11 = vadd.f32 %v982_v22, %v952_v44 }
 0x128   : > { %v984_v57 = vadd.f32 %v983_v11, %v953_v45  ;;  %v915_v50 = vadd.f32 %v1804_v43, %v914_v10 }
 0x12a   : > { %v916_v51 = vadd.f32 %v915_v50, %v714_v63  ;;  %v985_v52 = vadd.f32 %v984_v57, %v954_v48 }
 0x12c   : > { %v986_v54 = vadd.f32 %v985_v52, %v955_v39  ;;  %v917_v56 = vadd.f32 %v916_v51, %v717_v24 }
 0x12e   : > { %v918_v60 = vadd.f32 %v1811_v53, %v917_v56  ;;  %v987_v8 = vadd.f32 %v986_v54, %v956_v46 }
 0x130   : > { %v919_v1 = vadd.f32 %v1476_v14, %v918_v60  ;;  %v988_v3 = vadd.f32 %v987_v8, %v957_v58 }
 0x132   : > { %v920_v4 = vrot.slane %v919_v1, 4  ;;  %v989_v6 = vadd.f32 %v988_v3, %v958_v62 }
 0x134   : > { %v921_v43 = vadd.f32 %v920_v4, %v919_v1  ;;  %v990_v7 = vrot.slane %v989_v6, 4 }
 0x136   : > { %v922_v63 = vrot.slane %v921_v43, 2  ;;  %v991_v15 = vadd.f32 %v990_v7, %v989_v6 }
 0x138   : > { %v923_v16 = vadd.f32 %v922_v63, %v921_v43  ;;  %v992_v19 = vrot.slane %v991_v15, 2 }
 0x13a   : > { %v924_v20 = vrot.slane %v923_v16, 1  ;;  %v993_v24 = vadd.f32 %v992_v19, %v991_v15 }
 0x13c   : > { %v925_v53 = vadd.f32 %v924_v20, %v923_v16  ;;  %v994_v25 = vrot.slane %v993_v24, 1 }
 0x13e   : > { %926 = vst [vmem:[%s312_s7] sm:$0x1] %v925_v53  ;;  %v995_v14 = vadd.f32 %v994_v25, %v993_v24 }
 0x140   : > { %996 = vst [vmem:[%s312_s7 + $0x1] sm:$0x1] %v995_v14 }
 0x141 PF: > { %s16_s20 = sadd.s32 1, %s1547_s20   ;;  %s1875_s18 = smov %s1543_s19 }
 0x142   : > { %p13_p6 = scmp.ge.s32.totalorder %s16_s20, 4   ;;  %s1876_s19 = smov %s1878_s21 }
 0x144   :  { %15 = sbr.rel (!%p13_p6) target bundleno = 2 (0x2), region = 84 }

// kernel: residual_block_forward.7
= control target key start
LH: loop header
LB: loop body
LE: loop exit
PB: predicated region body
PF: predicated region fallthrough
CT: control target
= control target key end

     0   :  { %s951_s21 = smov 0   ;;  %s1193_s0 = inlined_call_operand.vmem [shape: bf16[512,128], index: 0, kind: input, shape index: {}]   ;;  %s1194_s1 = inlined_call_operand.vmem [shape: bf16[512,128], index: 1, kind: input, shape index: {}]   ;;  %s1195_s2 = inlined_call_operand.vmem [shape: f32[1,128], index: 2, kind: input, shape index: {}]   ;;  %s1196_s3 = inlined_call_operand.vmem [shape: f32[1,128], index: 3, kind: input, shape index: {}]   ;;  %s1197_s4 = inlined_call_operand.vmem [shape: f32[1,128], index: 4, kind: input, shape index: {}]   ;;  %s1198_s5 = inlined_call_operand.vmem [shape: f32[1,128], index: 5, kind: input, shape index: {}]   ;;  %s1199_s6 = inlined_call_operand.vmem [shape: f32[512,128], index: 6, kind: output, shape index: {}]  }
   0x1 LB: > { %s725_s22 = sadd.s32 4294967295, %s914_s21   ;;  %p729_p0 = scmp.ge.s32.totalorder %s914_s21, 1  ;;  %s914_s21 = sphi %s951_s21, %s16_s21  }
   0x2   : > { %p224_p1 = scmp.lt.s32.totalorder %s914_s21, 3 }
   0x4   : > { %p225_p2 = pnand %p729_p0, %p224_p1 }
   0x5   : > { %s730_s23 = sshll.u32 (!%p225_p2), %s725_s22, 5 }
   0x6   : > { %228 = sbr.rel (%p225_p2) target bundleno = 86 (0x56), region = 44  ;;  %p260_p3 = scmp.lt.s32.totalorder (!%p225_p2), %s730_s23, 63 }
   0xb   : > { %s1201_s23 = smov (!%p260_p3, %s730_s23), 63  ;;  %v975_v0 = vld [vmem:[%s1195_s2] ss:$0 sm:$0xff] }
   0xc   : > { %s731_s24 = sshll.u32 %s1201_s23, 2  ;;  %v980_v1 = vld [vmem:[%s1197_s4] ss:$0 sm:$0xff]  ;;  %s735_s15 = sshll.u32 %s1201_s23, 3 }
   0xd   : > { %s965_s27 = scalar_lea.vmem %s1193_s0, %s731_s24  ;;  %s970_s30 = scalar_lea.vmem %s1194_s1, %s731_s24  ;;  %v989_v10 = vld [vmem:[%s1196_s3] ss:$0 sm:$0xff] }
   0xe   : > { %v743_v2 = vld [vmem:[%s965_s27] sm:$0xff]   ;;  %v870_v4 = vld [vmem:[%s965_s27 + $0x8] sm:$0xff]   ;;  %v871_v24 = vld [vmem:[%s965_s27 + $0x10] sm:$0xff]   ;;  %s1018_s18 = scalar_lea.vmem %s1199_s6, %s735_s15 }
   0xf   : > { %v807_v3 = vld [vmem:[%s970_s30] sm:$0xff]   ;;  %v744_v5 = vunpack.c.l.bf16 %v743_v2  ;;  %v745_v7 = vunpack.c.h.bf16 %v743_v2  ;;  %v885_v9 = vld [vmem:[%s970_s30 + $0x8] sm:$0xff]   ;;  %v748_v12 = vunpack.c.l.bf16 %v870_v4  ;;  %v749_v14 = vunpack.c.h.bf16 %v870_v4  ;;  %v886_v25 = vld [vmem:[%s970_s30 + $0x10] sm:$0xff]  }
  0x10   : > { %v808_v6 = vunpack.c.l.bf16 %v807_v3  ;;  %v809_v8 = vunpack.c.h.bf16 %v807_v3  ;;  %v994_v11 = vld [vmem:[%s1198_s5] ss:$0 sm:$0xff]  ;;  %v812_v13 = vunpack.c.l.bf16 %v885_v9  ;;  %v813_v15 = vunpack.c.h.bf16 %v885_v9  ;;  %v872_v42 = vld [vmem:[%s965_s27 + $0x18] sm:$0xff]  }
  0x11   : > { %v348_v16 = vmul.f32 %v744_v5, %v975_v0  ;;  %v349_v18 = vmul.f32 %v745_v7, %v975_v0  ;;  %v350_v20 = vmul.f32 %v748_v12, %v975_v0  ;;  %v351_v22 = vmul.f32 %v749_v14, %v975_v0  ;;  %v887_v43 = vld [vmem:[%s970_s30 + $0x18] sm:$0xff]   ;;  %v873_v52 = vld [vmem:[%s965_s27 + $0x20] sm:$0xff]   ;;  %v874_v14 = vld [vmem:[%s965_s27 + $0x28] sm:$0xff]  }
  0x12   : > { %v490_v17 = vmul.f32 %v808_v6, %v980_v1  ;;  %v491_v19 = vmul.f32 %v809_v8, %v980_v1  ;;  %v492_v21 = vmul.f32 %v812_v13, %v980_v1  ;;  %v493_v23 = vmul.f32 %v813_v15, %v980_v1  ;;  %v888_v57 = vld [vmem:[%s970_s30 + $0x20] sm:$0xff]   ;;  %v889_v15 = vld [vmem:[%s970_s30 + $0x28] sm:$0xff]  }
  0x13   : > { %v387_v26 = vadd.f32 %v989_v10, %v348_v16  ;;  %v388_v28 = vadd.f32 %v989_v10, %v349_v18  ;;  %v389_v30 = vadd.f32 %v989_v10, %v350_v20  ;;  %v390_v32 = vadd.f32 %v989_v10, %v351_v22 }
  0x14   : > { %v529_v27 = vadd.f32 %v994_v11, %v490_v17  ;;  %v530_v29 = vadd.f32 %v994_v11, %v491_v19  ;;  %v531_v31 = vadd.f32 %v994_v11, %v492_v21  ;;  %v532_v33 = vadd.f32 %v994_v11, %v493_v23 }
  0x15   : > { %v752_v36 = vunpack.c.l.bf16 %v871_v24  ;;  %v816_v37 = vunpack.c.l.bf16 %v886_v25  ;;  %v753_v40 = vunpack.c.h.bf16 %v871_v24  ;;  %v817_v41 = vunpack.c.h.bf16 %v886_v25 }
  0x16   : > { %v561_v34 = vadd.f32 %v529_v27, %v387_v26  ;;  %v562_v35 = vadd.f32 %v530_v29, %v388_v28  ;;  %v563_v38 = vadd.f32 %v531_v31, %v389_v30  ;;  %v564_v39 = vadd.f32 %v532_v33, %v390_v32  ;;  %v875_v32 = vld [vmem:[%s965_s27 + $0x30] sm:$0xff]  }
  0x17   : > { %v352_v46 = vmul.f32 %v752_v36, %v975_v0  ;;  %v494_v47 = vmul.f32 %v816_v37, %v980_v1  ;;  %v353_v50 = vmul.f32 %v753_v40, %v975_v0  ;;  %v495_v51 = vmul.f32 %v817_v41, %v980_v1  ;;  %v890_v37 = vld [vmem:[%s970_s30 + $0x30] sm:$0xff]  }
  0x18   : > { %v593_v44 = vmax.f32 %v561_v34, 0.0  ;;  %v594_v45 = vmax.f32 %v562_v35, 0.0  ;;  %v595_v48 = vmax.f32 %v563_v38, 0.0  ;;  %v596_v49 = vmax.f32 %v564_v39, 0.0 }
  0x19   : > { %v391_v53 = vadd.f32 %v989_v10, %v352_v46  ;;  %v533_v54 = vadd.f32 %v994_v11, %v494_v47  ;;  %v756_v55 = vunpack.c.l.bf16 %v872_v42  ;;  %v820_v56 = vunpack.c.l.bf16 %v887_v43  ;;  %v876_v46 = vld [vmem:[%s965_s27 + $0x38] sm:$0xff]  }
  0x1a   : > { %625 = vst [vmem:[%s1018_s18] sm:$0xff] %v593_v44  ;;  %626 = vst [vmem:[%s1018_s18 + $0x8] sm:$0xff] %v594_v45  ;;  %v392_v58 = vadd.f32 %v989_v10, %v353_v50  ;;  %v534_v59 = vadd.f32 %v994_v11, %v495_v51  ;;  %v757_v60 = vunpack.c.h.bf16 %v872_v42  ;;  %v821_v61 = vunpack.c.h.bf16 %v887_v43 }
  0x1b   : > { %627 = vst [vmem:[%s1018_s18 + $0x10] sm:$0xff] %v595_v48  ;;  %628 = vst [vmem:[%s1018_s18 + $0x18] sm:$0xff] %v596_v49  ;;  %v565_v62 = vadd.f32 %v533_v54, %v391_v53  ;;  %v354_v63 = vmul.f32 %v756_v55, %v975_v0  ;;  %v496_v2 = vmul.f32 %v820_v56, %v980_v1  ;;  %v760_v3 = vunpack.c.l.bf16 %v873_v52  ;;  %v891_v55 = vld [vmem:[%s970_s30 + $0x38] sm:$0xff]  }
  0x1c   : > { %v566_v4 = vadd.f32 %v534_v59, %v392_v58  ;;  %v355_v5 = vmul.f32 %v757_v60, %v975_v0  ;;  %v497_v6 = vmul.f32 %v821_v61, %v980_v1  ;;  %v824_v7 = vunpack.c.l.bf16 %v888_v57 }
  0x1d   : > { %v597_v8 = vmax.f32 %v565_v62, 0.0  ;;  %v393_v9 = vadd.f32 %v989_v10, %v354_v63  ;;  %v535_v12 = vadd.f32 %v994_v11, %v496_v2  ;;  %v356_v13 = vmul.f32 %v760_v3, %v975_v0 }
  0x1e   : > { %v598_v16 = vmax.f32 %v566_v4, 0.0  ;;  %v394_v17 = vadd.f32 %v989_v10, %v355_v5  ;;  %v536_v18 = vadd.f32 %v994_v11, %v497_v6  ;;  %v498_v19 = vmul.f32 %v824_v7, %v980_v1  ;;  %v877_v6 = vld [vmem:[%s965_s27 + $0x40] sm:$0xff]  }
  0x1f   : > { %629 = vst [vmem:[%s1018_s18 + $0x20] sm:$0xff] %v597_v8  ;;  %v567_v20 = vadd.f32 %v535_v12, %v393_v9  ;;  %v395_v21 = vadd.f32 %v989_v10, %v356_v13  ;;  %v761_v22 = vunpack.c.h.bf16 %v873_v52  ;;  %v825_v23 = vunpack.c.h.bf16 %v888_v57  ;;  %v892_v13 = vld [vmem:[%s970_s30 + $0x40] sm:$0xff]  }
  0x20   : > { %630 = vst [vmem:[%s1018_s18 + $0x28] sm:$0xff] %v598_v16  ;;  %v568_v24 = vadd.f32 %v536_v18, %v394_v17  ;;  %v537_v25 = vadd.f32 %v994_v11, %v498_v19  ;;  %v764_v26 = vunpack.c.l.bf16 %v874_v14  ;;  %v828_v27 = vunpack.c.l.bf16 %v889_v15 }
  0x21   : > { %v599_v28 = vmax.f32 %v567_v20, 0.0  ;;  %v357_v29 = vmul.f32 %v761_v22, %v975_v0  ;;  %v499_v30 = vmul.f32 %v825_v23, %v980_v1  ;;  %v765_v31 = vunpack.c.h.bf16 %v874_v14 }
  0x22   : > { %v600_v33 = vmax.f32 %v568_v24, 0.0  ;;  %v569_v34 = vadd.f32 %v537_v25, %v395_v21  ;;  %v358_v35 = vmul.f32 %v764_v26, %v975_v0  ;;  %v500_v36 = vmul.f32 %v828_v27, %v980_v1  ;;  %v878_v26 = vld [vmem:[%s965_s27 + $0x48] sm:$0xff]  }
  0x23   : > { %631 = vst [vmem:[%s1018_s18 + $0x30] sm:$0xff] %v599_v28  ;;  %v396_v38 = vadd.f32 %v989_v10, %v357_v29  ;;  %v538_v39 = vadd.f32 %v994_v11, %v499_v30  ;;  %v359_v40 = vmul.f32 %v765_v31, %v975_v0  ;;  %v829_v41 = vunpack.c.h.bf16 %v889_v15  ;;  %v893_v27 = vld [vmem:[%s970_s30 + $0x48] sm:$0xff]  }
  0x24   : > { %632 = vst [vmem:[%s1018_s18 + $0x38] sm:$0xff] %v600_v33  ;;  %v601_v42 = vmax.f32 %v569_v34, 0.0  ;;  %v397_v43 = vadd.f32 %v989_v10, %v358_v35  ;;  %v539_v44 = vadd.f32 %v994_v11, %v500_v36  ;;  %v768_v45 = vunpack.c.l.bf16 %v875_v32 }
  0x25   : > { %v570_v47 = vadd.f32 %v538_v39, %v396_v38  ;;  %v398_v48 = vadd.f32 %v989_v10, %v359_v40  ;;  %v501_v49 = vmul.f32 %v829_v41, %v980_v1  ;;  %v832_v50 = vunpack.c.l.bf16 %v890_v37  ;;  %v879_v40 = vld [vmem:[%s965_s27 + $0x50] sm:$0xff]  }
  0x26   : > { %633 = vst [vmem:[%s1018_s18 + $0x40] sm:$0xff] %v601_v42  ;;  %v571_v51 = vadd.f32 %v539_v44, %v397_v43  ;;  %v360_v52 = vmul.f32 %v768_v45, %v975_v0  ;;  %v769_v53 = vunpack.c.h.bf16 %v875_v32  ;;  %v833_v54 = vunpack.c.h.bf16 %v890_v37  ;;  %v894_v45 = vld [vmem:[%s970_s30 + $0x50] sm:$0xff]  }
  0x27   : > { %v602_v56 = vmax.f32 %v570_v47, 0.0  ;;  %v540_v57 = vadd.f32 %v994_v11, %v501_v49  ;;  %v502_v58 = vmul.f32 %v832_v50, %v980_v1  ;;  %v772_v59 = vunpack.c.l.bf16 %v876_v46 }
  0x28   : > { %v603_v60 = vmax.f32 %v571_v51, 0.0  ;;  %v399_v61 = vadd.f32 %v989_v10, %v360_v52  ;;  %v361_v62 = vmul.f32 %v769_v53, %v975_v0  ;;  %v503_v63 = vmul.f32 %v833_v54, %v980_v1 }
  0x29   : > { %634 = vst [vmem:[%s1018_s18 + $0x48] sm:$0xff] %v602_v56  ;;  %v572_v2 = vadd.f32 %v540_v57, %v398_v48  ;;  %v541_v3 = vadd.f32 %v994_v11, %v502_v58  ;;  %v362_v4 = vmul.f32 %v772_v59, %v975_v0  ;;  %v836_v5 = vunpack.c.l.bf16 %v891_v55 }
  0x2a   : > { %635 = vst [vmem:[%s1018_s18 + $0x50] sm:$0xff] %v603_v60  ;;  %v400_v7 = vadd.f32 %v989_v10, %v361_v62  ;;  %v542_v8 = vadd.f32 %v994_v11, %v503_v63  ;;  %v773_v9 = vunpack.c.h.bf16 %v876_v46  ;;  %v837_v12 = vunpack.c.h.bf16 %v891_v55  ;;  %v880_v62 = vld [vmem:[%s965_s27 + $0x58] sm:$0xff]  }
  0x2b   : > { %v604_v14 = vmax.f32 %v572_v2, 0.0  ;;  %v573_v15 = vadd.f32 %v541_v3, %v399_v61  ;;  %v401_v16 = vadd.f32 %v989_v10, %v362_v4  ;;  %v504_v17 = vmul.f32 %v836_v5, %v980_v1  ;;  %v895_v5 = vld [vmem:[%s970_s30 + $0x58] sm:$0xff]  }
  0x2c   : > { %v574_v18 = vadd.f32 %v542_v8, %v400_v7  ;;  %v363_v19 = vmul.f32 %v773_v9, %v975_v0  ;;  %v505_v20 = vmul.f32 %v837_v12, %v980_v1  ;;  %v776_v21 = vunpack.c.l.bf16 %v877_v6 }
  0x2d   : > { %636 = vst [vmem:[%s1018_s18 + $0x58] sm:$0xff] %v604_v14  ;;  %v605_v22 = vmax.f32 %v573_v15, 0.0  ;;  %v543_v23 = vadd.f32 %v994_v11, %v504_v17  ;;  %v840_v24 = vunpack.c.l.bf16 %v892_v13  ;;  %v777_v25 = vunpack.c.h.bf16 %v877_v6 }
  0x2e   : > { %v606_v28 = vmax.f32 %v574_v18, 0.0  ;;  %v402_v29 = vadd.f32 %v989_v10, %v363_v19  ;;  %v544_v30 = vadd.f32 %v994_v11, %v505_v20  ;;  %v364_v31 = vmul.f32 %v776_v21, %v975_v0  ;;  %v881_v20 = vld [vmem:[%s965_s27 + $0x60] sm:$0xff]  }
  0x2f   : > { %637 = vst [vmem:[%s1018_s18 + $0x60] sm:$0xff] %v605_v22  ;;  %v575_v32 = vadd.f32 %v543_v23, %v401_v16  ;;  %v506_v33 = vmul.f32 %v840_v24, %v980_v1  ;;  %v365_v34 = vmul.f32 %v777_v25, %v975_v0  ;;  %v841_v35 = vunpack.c.h.bf16 %v892_v13  ;;  %v896_v25 = vld [vmem:[%s970_s30 + $0x60] sm:$0xff]  }
  0x30   : > { %638 = vst [vmem:[%s1018_s18 + $0x68] sm:$0xff] %v606_v28  ;;  %v576_v36 = vadd.f32 %v544_v30, %v402_v29  ;;  %v403_v37 = vadd.f32 %v989_v10, %v364_v31  ;;  %v780_v38 = vunpack.c.l.bf16 %v878_v26  ;;  %v844_v39 = vunpack.c.l.bf16 %v893_v27 }
  0x31   : > { %v607_v41 = vmax.f32 %v575_v32, 0.0  ;;  %v545_v42 = vadd.f32 %v994_v11, %v506_v33  ;;  %v404_v43 = vadd.f32 %v989_v10, %v365_v34  ;;  %v507_v44 = vmul.f32 %v841_v35, %v980_v1  ;;  %v882_v34 = vld [vmem:[%s965_s27 + $0x68] sm:$0xff]  }
  0x32   : > { %v608_v46 = vmax.f32 %v576_v36, 0.0  ;;  %v366_v47 = vmul.f32 %v780_v38, %v975_v0  ;;  %v508_v48 = vmul.f32 %v844_v39, %v980_v1  ;;  %v781_v49 = vunpack.c.h.bf16 %v878_v26 }
  0x33   : > { %639 = vst [vmem:[%s1018_s18 + $0x70] sm:$0xff] %v607_v41  ;;  %v577_v50 = vadd.f32 %v545_v42, %v403_v37  ;;  %v546_v51 = vadd.f32 %v994_v11, %v507_v44  ;;  %v845_v52 = vunpack.c.h.bf16 %v893_v27  ;;  %v784_v53 = vunpack.c.l.bf16 %v879_v40 }
  0x34   : > { %640 = vst [vmem:[%s1018_s18 + $0x78] sm:$0xff] %v608_v46  ;;  %v405_v54 = vadd.f32 %v989_v10, %v366_v47  ;;  %v547_v55 = vadd.f32 %v994_v11, %v508_v48  ;;  %v367_v56 = vmul.f32 %v781_v49, %v975_v0  ;;  %v848_v57 = vunpack.c.l.bf16 %v894_v45 }
  0x35   : > { %v609_v58 = vmax.f32 %v577_v50, 0.0  ;;  %v578_v59 = vadd.f32 %v546_v51, %v404_v43  ;;  %v509_v60 = vmul.f32 %v845_v52, %v980_v1  ;;  %v368_v61 = vmul.f32 %v784_v53, %v975_v0  ;;  %v897_v43 = vld [vmem:[%s970_s30 + $0x68] sm:$0xff]  }
  0x36   : > { %v579_v63 = vadd.f32 %v547_v55, %v405_v54  ;;  %v406_v2 = vadd.f32 %v989_v10, %v367_v56  ;;  %v510_v3 = vmul.f32 %v848_v57, %v980_v1  ;;  %v785_v4 = vunpack.c.h.bf16 %v879_v40  ;;  %v883_v56 = vld [vmem:[%s965_s27 + $0x70] sm:$0xff]  }
  0x37   : > { %641 = vst [vmem:[%s1018_s18 + $0x80] sm:$0xff] %v609_v58  ;;  %v610_v6 = vmax.f32 %v578_v59, 0.0  ;;  %v548_v7 = vadd.f32 %v994_v11, %v509_v60  ;;  %v407_v8 = vadd.f32 %v989_v10, %v368_v61  ;;  %v849_v9 = vunpack.c.h.bf16 %v894_v45  ;;  %v898_v57 = vld [vmem:[%s970_s30 + $0x70] sm:$0xff]  }
  0x38   : > { %v611_v12 = vmax.f32 %v579_v63, 0.0  ;;  %v549_v13 = vadd.f32 %v994_v11, %v510_v3  ;;  %v369_v14 = vmul.f32 %v785_v4, %v975_v0  ;;  %v788_v15 = vunpack.c.l.bf16 %v880_v62 }
  0x39   : > { %642 = vst [vmem:[%s1018_s18 + $0x88] sm:$0xff] %v610_v6  ;;  %v580_v16 = vadd.f32 %v548_v7, %v406_v2  ;;  %v511_v17 = vmul.f32 %v849_v9, %v980_v1  ;;  %v852_v18 = vunpack.c.l.bf16 %v895_v5  ;;  %v789_v19 = vunpack.c.h.bf16 %v880_v62 }
  0x3a   : > { %643 = vst [vmem:[%s1018_s18 + $0x90] sm:$0xff] %v611_v12  ;;  %v581_v21 = vadd.f32 %v549_v13, %v407_v8  ;;  %v408_v22 = vadd.f32 %v989_v10, %v369_v14  ;;  %v370_v23 = vmul.f32 %v788_v15, %v975_v0  ;;  %v853_v24 = vunpack.c.h.bf16 %v895_v5  ;;  %v884_v14 = vld [vmem:[%s965_s27 + $0x78] sm:$0xff]  }
  0x3b   : > { %v612_v26 = vmax.f32 %v580_v16, 0.0  ;;  %v550_v27 = vadd.f32 %v994_v11, %v511_v17  ;;  %v512_v28 = vmul.f32 %v852_v18, %v980_v1  ;;  %v371_v29 = vmul.f32 %v789_v19, %v975_v0  ;;  %v899_v15 = vld [vmem:[%s970_s30 + $0x78] sm:$0xff]  }
  0x3c   : > { %v613_v30 = vmax.f32 %v581_v21, 0.0  ;;  %v409_v31 = vadd.f32 %v989_v10, %v370_v23  ;;  %v513_v32 = vmul.f32 %v853_v24, %v980_v1  ;;  %v792_v33 = vunpack.c.l.bf16 %v881_v20 }
  0x3d   : > { %644 = vst [vmem:[%s1018_s18 + $0x98] sm:$0xff] %v612_v26  ;;  %v582_v35 = vadd.f32 %v550_v27, %v408_v22  ;;  %v551_v36 = vadd.f32 %v994_v11, %v512_v28  ;;  %v410_v37 = vadd.f32 %v989_v10, %v371_v29  ;;  %v856_v38 = vunpack.c.l.bf16 %v896_v25 }
  0x3e   : > { %645 = vst [vmem:[%s1018_s18 + $0xa0] sm:$0xff] %v613_v30  ;;  %v552_v39 = vadd.f32 %v994_v11, %v513_v32  ;;  %v372_v40 = vmul.f32 %v792_v33, %v975_v0  ;;  %v793_v41 = vunpack.c.h.bf16 %v881_v20  ;;  %v857_v42 = vunpack.c.h.bf16 %v896_v25 }
  0x3f   : > { %v614_v44 = vmax.f32 %v582_v35, 0.0  ;;  %v583_v45 = vadd.f32 %v551_v36, %v409_v31  ;;  %v514_v46 = vmul.f32 %v856_v38, %v980_v1  ;;  %v796_v47 = vunpack.c.l.bf16 %v882_v34 }
  0x40   : > { %v584_v48 = vadd.f32 %v552_v39, %v410_v37  ;;  %v411_v49 = vadd.f32 %v989_v10, %v372_v40  ;;  %v373_v50 = vmul.f32 %v793_v41, %v975_v0  ;;  %v515_v51 = vmul.f32 %v857_v42, %v980_v1 }
  0x41   : > { %646 = vst [vmem:[%s1018_s18 + $0xa8] sm:$0xff] %v614_v44  ;;  %v615_v52 = vmax.f32 %v583_v45, 0.0  ;;  %v553_v53 = vadd.f32 %v994_v11, %v514_v46  ;;  %v374_v54 = vmul.f32 %v796_v47, %v975_v0  ;;  %v860_v55 = vunpack.c.l.bf16 %v897_v43 }
  0x42   : > { %v616_v58 = vmax.f32 %v584_v48, 0.0  ;;  %v412_v59 = vadd.f32 %v989_v10, %v373_v50  ;;  %v554_v60 = vadd.f32 %v994_v11, %v515_v51  ;;  %v797_v61 = vunpack.c.h.bf16 %v882_v34 }
  0x43   : > { %647 = vst [vmem:[%s1018_s18 + $0xb0] sm:$0xff] %v615_v52  ;;  %v585_v62 = vadd.f32 %v553_v53, %v411_v49  ;;  %v413_v63 = vadd.f32 %v989_v10, %v374_v54  ;;  %v516_v2 = vmul.f32 %v860_v55, %v980_v1  ;;  %v861_v3 = vunpack.c.h.bf16 %v897_v43 }
  0x44   : > { %648 = vst [vmem:[%s1018_s18 + $0xb8] sm:$0xff] %v616_v58  ;;  %v586_v4 = vadd.f32 %v554_v60, %v412_v59  ;;  %v375_v5 = vmul.f32 %v797_v61, %v975_v0  ;;  %v800_v6 = vunpack.c.l.bf16 %v883_v56  ;;  %v864_v7 = vunpack.c.l.bf16 %v898_v57 }
  0x45   : > { %v617_v8 = vmax.f32 %v585_v62, 0.0  ;;  %v555_v9 = vadd.f32 %v994_v11, %v516_v2  ;;  %v517_v12 = vmul.f32 %v861_v3, %v980_v1  ;;  %v801_v13 = vunpack.c.h.bf16 %v883_v56 }
  0x46   : > { %v618_v16 = vmax.f32 %v586_v4, 0.0  ;;  %v414_v17 = vadd.f32 %v989_v10, %v375_v5  ;;  %v376_v18 = vmul.f32 %v800_v6, %v975_v0  ;;  %v518_v19 = vmul.f32 %v864_v7, %v980_v1 }
  0x47   : > { %649 = vst [vmem:[%s1018_s18 + $0xc0] sm:$0xff] %v617_v8  ;;  %v587_v20 = vadd.f32 %v555_v9, %v413_v63  ;;  %v556_v21 = vadd.f32 %v994_v11, %v517_v12  ;;  %v377_v22 = vmul.f32 %v801_v13, %v975_v0  ;;  %v865_v23 = vunpack.c.h.bf16 %v898_v57 }
  0x48   : > { %650 = vst [vmem:[%s1018_s18 + $0xc8] sm:$0xff] %v618_v16  ;;  %v415_v24 = vadd.f32 %v989_v10, %v376_v18  ;;  %v557_v25 = vadd.f32 %v994_v11, %v518_v19  ;;  %v804_v26 = vunpack.c.l.bf16 %v884_v14  ;;  %v868_v27 = vunpack.c.l.bf16 %v899_v15 }
  0x49   : > { %v619_v28 = vmax.f32 %v587_v20, 0.0  ;;  %v588_v29 = vadd.f32 %v556_v21, %v414_v17  ;;  %v416_v30 = vadd.f32 %v989_v10, %v377_v22  ;;  %v519_v31 = vmul.f32 %v865_v23, %v980_v1 }
  0x4a   : > { %v589_v32 = vadd.f32 %v557_v25, %v415_v24  ;;  %v378_v33 = vmul.f32 %v804_v26, %v975_v0  ;;  %v520_v34 = vmul.f32 %v868_v27, %v980_v1  ;;  %v805_v35 = vunpack.c.h.bf16 %v884_v14 }
  0x4b   : > { %651 = vst [vmem:[%s1018_s18 + $0xd0] sm:$0xff] %v619_v28  ;;  %v620_v36 = vmax.f32 %v588_v29, 0.0  ;;  %v558_v37 = vadd.f32 %v994_v11, %v519_v31  ;;  %v869_v38 = vunpack.c.h.bf16 %v899_v15 }
  0x4c   : > { %v621_v39 = vmax.f32 %v589_v32, 0.0  ;;  %v417_v40 = vadd.f32 %v989_v10, %v378_v33  ;;  %v559_v41 = vadd.f32 %v994_v11, %v520_v34  ;;  %v379_v42 = vmul.f32 %v805_v35, %v975_v0 }
  0x4d   : > { %652 = vst [vmem:[%s1018_s18 + $0xd8] sm:$0xff] %v620_v36  ;;  %v590_v43 = vadd.f32 %v558_v37, %v416_v30  ;;  %v521_v44 = vmul.f32 %v869_v38, %v980_v1 }
  0x4e   : > { %653 = vst [vmem:[%s1018_s18 + $0xe0] sm:$0xff] %v621_v39  ;;  %v591_v45 = vadd.f32 %v559_v41, %v417_v40  ;;  %v418_v46 = vadd.f32 %v989_v10, %v379_v42 }
  0x4f   : > { %v622_v47 = vmax.f32 %v590_v43, 0.0  ;;  %v560_v48 = vadd.f32 %v994_v11, %v521_v44 }
  0x50   : > { %v623_v49 = vmax.f32 %v591_v45, 0.0 }
  0x51   : > { %654 = vst [vmem:[%s1018_s18 + $0xe8] sm:$0xff] %v622_v47  ;;  %v592_v50 = vadd.f32 %v560_v48, %v418_v46 }
  0x52   : > { %655 = vst [vmem:[%s1018_s18 + $0xf0] sm:$0xff] %v623_v49 }
  0x53   : > { %v624_v51 = vmax.f32 %v592_v50, 0.0 }
  0x55   : > { %656 = vst [vmem:[%s1018_s18 + $0xf8] sm:$0xff] %v624_v51 }
  0x56 PF: > { %s16_s21 = sadd.s32 1, %s914_s21  }
  0x57   : > { %p13_p4 = scmp.ge.s32.totalorder %s16_s21, 4  }
  0x59   :  { %15 = sbr.rel (!%p13_p4) target bundleno = 1 (0x1), region = 77 }

</bundles_post_ra>
